<compile_context>
chip_gen: v5e
topology: v5e:2x2
jax: 0.10.0
libtpu: 0.0.40
codegen_flags: <defaults>
</compile_context>

<pallas_src>
import functools

import jax
import jax.numpy as jnp
from jax.experimental import pallas as pl
from jax.experimental.pallas import tpu as pltpu

IN_CHANNELS = 3
OUT_CHANNELS = 1
BN_EPS = 1e-5


def _down_kernel(xp_ref, p_ref, o_ref, y1pad_ref, *, n, hp, wp, cin):
    # xp_ref    : (cin, n*(hp+2), wp+2) f32 VMEM, zero-halo padded pooled planes
    # p_ref     : (9*cin + 9 + 4,)      f32 SMEM, packed weights + BN affine
    # o_ref     : (n*hp, wp)            f32 VMEM, conv2/BN2/ReLU output
    # y1pad_ref : (n*(hp+2), wp+2)      f32 VMEM scratch, padded y1 plane
    hp2 = hp + 2
    w2_off = 9 * cin
    sc_off = w2_off + 9
    inv_cnt = 1.0 / float(n * hp * wp)

    def conv3x3(load_tap):
        # 9-tap SAME conv via static offset reads of a zero-halo padded plane:
        # no rolls, no masks; acc initialised from the first tap.
        acc = None
        for kh in range(3):
            for kw in range(3):
                tap = load_tap(kh, kw)
                acc = tap if acc is None else acc + tap
        return acc

    def bn_scale_shift(blocks, g, be):
        # training-mode BatchNorm2d (single channel, biased variance), folded
        # into y = acc*scale + shift; centered two-pass variance.
        s = None
        for blk in blocks:
            t = jnp.sum(blk)
            s = t if s is None else s + t
        mean = s * inv_cnt
        v = None
        for blk in blocks:
            d = blk - mean
            t = jnp.sum(d * d)
            v = t if v is None else v + t
        var = v * inv_cnt
        scale = g * jax.lax.rsqrt(var + BN_EPS)
        shift = be - mean * scale
        return scale, shift

    # ---------------- conv1 (cin -> 1) over padded pooled planes ----------------
    def tap1(b):
        r0 = b * hp2

        def load(kh, kw):
            t = None
            for c in range(cin):
                wgt = p_ref[(kh * 3 + kw) * cin + c]
                blk = xp_ref[c, pl.ds(r0 + kh, hp), pl.ds(kw, wp)]
                term = blk * wgt
                t = term if t is None else t + term
            return t

        return load

    acc1 = [conv3x3(tap1(b)) for b in range(n)]
    scale1, shift1 = bn_scale_shift(acc1, p_ref[sc_off + 0], p_ref[sc_off + 1])

    # zero the intermediate plane once (halo must be zero), then fill interior
    y1pad_ref[...] = jnp.zeros_like(y1pad_ref)
    for b in range(n):
        r0 = b * hp2
        y1 = jnp.maximum(acc1[b] * scale1 + shift1, 0.0)
        y1pad_ref[pl.ds(r0 + 1, hp), pl.ds(1, wp)] = y1

    # ---------------- conv2 (1 -> 1) over padded y1 plane ----------------
    def tap2(b):
        r0 = b * hp2

        def load(kh, kw):
            wgt = p_ref[w2_off + kh * 3 + kw]
            return y1pad_ref[pl.ds(r0 + kh, hp), pl.ds(kw, wp)] * wgt

        return load

    acc2 = [conv3x3(tap2(b)) for b in range(n)]
    scale2, shift2 = bn_scale_shift(acc2, p_ref[sc_off + 2], p_ref[sc_off + 3])

    for b in range(n):
        y2 = jnp.maximum(acc2[b] * scale2 + shift2, 0.0)
        o_ref[pl.ds(b * hp, hp), :] = y2


def init_params(key):
    ks = jax.random.split(key, 8)
    w1 = 0.2 * jax.random.normal(ks[0], (3, 3, IN_CHANNELS), jnp.float32)  # HWI (O=1)
    b1 = 0.1 * jax.random.normal(ks[1], (), jnp.float32)
    g1 = 1.0 + 0.1 * jax.random.normal(ks[2], (), jnp.float32)
    be1 = 0.1 * jax.random.normal(ks[3], (), jnp.float32)
    w2 = 0.2 * jax.random.normal(ks[4], (3, 3), jnp.float32)
    b2 = 0.1 * jax.random.normal(ks[5], (), jnp.float32)
    g2 = 1.0 + 0.1 * jax.random.normal(ks[6], (), jnp.float32)
    be2 = 0.1 * jax.random.normal(ks[7], (), jnp.float32)
    return (w1, b1, g1, be1, w2, b2, g2, be2)


@jax.jit
def down_forward(x_nchw, params):
    w1, b1, g1, be1, w2, b2, g2, be2 = params
    del b1, b2  # conv bias is cancelled exactly by training-mode BN mean subtraction

    x = x_nchw.astype(jnp.float32)
    n, cin, h, w = x.shape
    hp, wp = h // 2, w // 2

    # MaxPool2d(2) in the wrapper: the kernel only DMAs X/4 bytes; no full-X
    # deinterleave/transpose ever touches HBM.
    pooled = jax.lax.reduce_window(x, -jnp.inf, jax.lax.max,
                                   (1, 1, 2, 2), (1, 1, 2, 2), 'VALID')

    # Channel-major planes with a per-sample zero halo: (cin, n*(hp+2), wp+2).
    # wp sits on the 128-lane axis, rows on sublanes; every conv tap becomes a
    # plain offset read (no rolls, no masks, no mask DMA). Pad/transpose act on
    # pooled (X/4) data only and fuse into one small XLA fusion.
    xp = jnp.pad(jnp.transpose(pooled, (1, 0, 2, 3)),
                 ((0, 0), (0, 0), (1, 1), (1, 1)))
    xp = xp.reshape(cin, n * (hp + 2), wp + 2)

    # All conv weights + BN affine params packed into one small SMEM vector.
    p = jnp.concatenate([
        w1.reshape(-1),                      # 9 * cin
        w2.reshape(-1),                      # 9
        jnp.stack([g1, be1, g2, be2]),       # 4
    ]).astype(jnp.float32)

    kernel = functools.partial(_down_kernel, n=n, hp=hp, wp=wp, cin=cin)
    out = pl.pallas_call(
        kernel,
        out_shape=jax.ShapeDtypeStruct((n * hp, wp), jnp.float32),
        in_specs=[pl.BlockSpec(memory_space=pltpu.MemorySpace.VMEM),   # padded planes
                  pl.BlockSpec(memory_space=pltpu.MemorySpace.SMEM)],  # packed params
        out_specs=pl.BlockSpec(memory_space=pltpu.MemorySpace.VMEM),
        scratch_shapes=[pltpu.VMEM((n * (hp + 2), wp + 2), jnp.float32)],
    )(xp, p)

    # (n*hp, wp) -> NCHW with cout = 1 (pure metadata reshape, no transpose)
    return out.reshape(n, 1, hp, wp)


def down_reference(x_nchw, params):
    # Pure-JAX reference (XLA conv / reduce_window), faithful to the PyTorch
    # module (including the conv biases).
    w1, b1, g1, be1, w2, b2, g2, be2 = params
    x = jnp.transpose(x_nchw, (0, 2, 3, 1)).astype(jnp.float32)   # NHWC
    pooled = jax.lax.reduce_window(x, -jnp.inf, jax.lax.max,
                                   (1, 2, 2, 1), (1, 2, 2, 1), 'VALID')

    def block(y, w_hwio, b, g, be):
        y = jax.lax.conv_general_dilated(
            y, w_hwio, window_strides=(1, 1), padding='SAME',
            dimension_numbers=('NHWC', 'HWIO', 'NHWC')) + b
        m = jnp.mean(y, axis=(0, 1, 2), keepdims=True)
        v = jnp.mean((y - m) ** 2, axis=(0, 1, 2), keepdims=True)
        y = (y - m) * jax.lax.rsqrt(v + BN_EPS) * g + be
        return jnp.maximum(y, 0.0)

    y = block(pooled, w1[..., None], b1, g1, be1)
    y = block(y, w2[..., None, None], b2, g2, be2)
    return jnp.transpose(y, (0, 3, 1, 2))


if __name__ == "__main__":
    key = jax.random.PRNGKey(0)
    kx, kp = jax.random.split(key)
    # PyTorch-style NCHW input: batch=2, in_channels=3, 16x16 spatial
    x = jax.random.normal(kx, (2, IN_CHANNELS, 16, 16), jnp.float32)
    params = init_params(kp)

    out = jax.block_until_ready(down_forward(x, params))
    assert out.shape == (2, OUT_CHANNELS, 8, 8), out.shape

    ref = down_reference(x, params)
    err = float(jnp.max(jnp.abs(out - ref)))
    if err > 1e-4:
        raise AssertionError(f"kernel/reference mismatch, max abs err = {err}")

    print("KERNEL_OK")
</pallas_src>

<mosaic_0001>
module attributes {stable_mosaic.version = 11 : i64} {
  func.func @_down_kernel(%arg0: memref<3x20x10xf32, #tpu.memory_space<vmem>>, %arg1: memref<40xf32, #tpu.memory_space<smem>>, %arg2: memref<16x8xf32, #tpu.memory_space<vmem>>, %arg3: memref<20x10xf32, #tpu.memory_space<vmem>>) attributes {dimension_semantics = [], scalar_prefetch = 0 : i64, scratch_operands = 1 : i64, tpu.core_type = #tpu.core_type<tc>} {
    %c0 = arith.constant 0 : index
    %0 = memref.load %arg1[%c0] : memref<40xf32, #tpu.memory_space<smem>>
    %c0_0 = arith.constant 0 : index
    %c0_1 = arith.constant 0 : index
    %c0_2 = arith.constant 0 : index
    %1 = vector.load %arg0[%c0_0, %c0_1, %c0_2] : memref<3x20x10xf32, #tpu.memory_space<vmem>>, vector<1x8x8xf32>
    %2 = vector.shape_cast %1 : vector<1x8x8xf32> to vector<8x8xf32>
    %3 = vector.broadcast %0 : f32 to vector<8x8xf32>
    %4 = arith.mulf %2, %3 : vector<8x8xf32>
    %c1 = arith.constant 1 : index
    %5 = memref.load %arg1[%c1] : memref<40xf32, #tpu.memory_space<smem>>
    %c1_3 = arith.constant 1 : index
    %c0_4 = arith.constant 0 : index
    %c0_5 = arith.constant 0 : index
    %6 = vector.load %arg0[%c1_3, %c0_4, %c0_5] : memref<3x20x10xf32, #tpu.memory_space<vmem>>, vector<1x8x8xf32>
    %7 = vector.shape_cast %6 : vector<1x8x8xf32> to vector<8x8xf32>
    %8 = vector.broadcast %5 : f32 to vector<8x8xf32>
    %9 = arith.mulf %7, %8 : vector<8x8xf32>
    %10 = arith.addf %4, %9 : vector<8x8xf32>
    %c2 = arith.constant 2 : index
    %11 = memref.load %arg1[%c2] : memref<40xf32, #tpu.memory_space<smem>>
    %c2_6 = arith.constant 2 : index
    %c0_7 = arith.constant 0 : index
    %c0_8 = arith.constant 0 : index
    %12 = vector.load %arg0[%c2_6, %c0_7, %c0_8] : memref<3x20x10xf32, #tpu.memory_space<vmem>>, vector<1x8x8xf32>
    %13 = vector.shape_cast %12 : vector<1x8x8xf32> to vector<8x8xf32>
    %14 = vector.broadcast %11 : f32 to vector<8x8xf32>
    %15 = arith.mulf %13, %14 : vector<8x8xf32>
    %16 = arith.addf %10, %15 : vector<8x8xf32>
    %c3 = arith.constant 3 : index
    %17 = memref.load %arg1[%c3] : memref<40xf32, #tpu.memory_space<smem>>
    %c0_9 = arith.constant 0 : index
    %c0_10 = arith.constant 0 : index
    %c1_11 = arith.constant 1 : index
    %18 = vector.load %arg0[%c0_9, %c0_10, %c1_11] : memref<3x20x10xf32, #tpu.memory_space<vmem>>, vector<1x8x8xf32>
    %19 = vector.shape_cast %18 : vector<1x8x8xf32> to vector<8x8xf32>
    %20 = vector.broadcast %17 : f32 to vector<8x8xf32>
    %21 = arith.mulf %19, %20 : vector<8x8xf32>
    %c4 = arith.constant 4 : index
    %22 = memref.load %arg1[%c4] : memref<40xf32, #tpu.memory_space<smem>>
    %c1_12 = arith.constant 1 : index
    %c0_13 = arith.constant 0 : index
    %c1_14 = arith.constant 1 : index
    %23 = vector.load %arg0[%c1_12, %c0_13, %c1_14] : memref<3x20x10xf32, #tpu.memory_space<vmem>>, vector<1x8x8xf32>
    %24 = vector.shape_cast %23 : vector<1x8x8xf32> to vector<8x8xf32>
    %25 = vector.broadcast %22 : f32 to vector<8x8xf32>
    %26 = arith.mulf %24, %25 : vector<8x8xf32>
    %27 = arith.addf %21, %26 : vector<8x8xf32>
    %c5 = arith.constant 5 : index
    %28 = memref.load %arg1[%c5] : memref<40xf32, #tpu.memory_space<smem>>
    %c2_15 = arith.constant 2 : index
    %c0_16 = arith.constant 0 : index
    %c1_17 = arith.constant 1 : index
    %29 = vector.load %arg0[%c2_15, %c0_16, %c1_17] : memref<3x20x10xf32, #tpu.memory_space<vmem>>, vector<1x8x8xf32>
    %30 = vector.shape_cast %29 : vector<1x8x8xf32> to vector<8x8xf32>
    %31 = vector.broadcast %28 : f32 to vector<8x8xf32>
    %32 = arith.mulf %30, %31 : vector<8x8xf32>
    %33 = arith.addf %27, %32 : vector<8x8xf32>
    %34 = arith.addf %16, %33 : vector<8x8xf32>
    %c6 = arith.constant 6 : index
    %35 = memref.load %arg1[%c6] : memref<40xf32, #tpu.memory_space<smem>>
    %c0_18 = arith.constant 0 : index
    %c0_19 = arith.constant 0 : index
    %c2_20 = arith.constant 2 : index
    %36 = vector.load %arg0[%c0_18, %c0_19, %c2_20] : memref<3x20x10xf32, #tpu.memory_space<vmem>>, vector<1x8x8xf32>
    %37 = vector.shape_cast %36 : vector<1x8x8xf32> to vector<8x8xf32>
    %38 = vector.broadcast %35 : f32 to vector<8x8xf32>
    %39 = arith.mulf %37, %38 : vector<8x8xf32>
    %c7 = arith.constant 7 : index
    %40 = memref.load %arg1[%c7] : memref<40xf32, #tpu.memory_space<smem>>
    %c1_21 = arith.constant 1 : index
    %c0_22 = arith.constant 0 : index
    %c2_23 = arith.constant 2 : index
    %41 = vector.load %arg0[%c1_21, %c0_22, %c2_23] : memref<3x20x10xf32, #tpu.memory_space<vmem>>, vector<1x8x8xf32>
    %42 = vector.shape_cast %41 : vector<1x8x8xf32> to vector<8x8xf32>
    %43 = vector.broadcast %40 : f32 to vector<8x8xf32>
    %44 = arith.mulf %42, %43 : vector<8x8xf32>
    %45 = arith.addf %39, %44 : vector<8x8xf32>
    %c8 = arith.constant 8 : index
    %46 = memref.load %arg1[%c8] : memref<40xf32, #tpu.memory_space<smem>>
    %c2_24 = arith.constant 2 : index
    %c0_25 = arith.constant 0 : index
    %c2_26 = arith.constant 2 : index
    %47 = vector.load %arg0[%c2_24, %c0_25, %c2_26] : memref<3x20x10xf32, #tpu.memory_space<vmem>>, vector<1x8x8xf32>
    %48 = vector.shape_cast %47 : vector<1x8x8xf32> to vector<8x8xf32>
    %49 = vector.broadcast %46 : f32 to vector<8x8xf32>
    %50 = arith.mulf %48, %49 : vector<8x8xf32>
    %51 = arith.addf %45, %50 : vector<8x8xf32>
    %52 = arith.addf %34, %51 : vector<8x8xf32>
    %c9 = arith.constant 9 : index
    %53 = memref.load %arg1[%c9] : memref<40xf32, #tpu.memory_space<smem>>
    %c0_27 = arith.constant 0 : index
    %c1_28 = arith.constant 1 : index
    %c0_29 = arith.constant 0 : index
    %54 = vector.load %arg0[%c0_27, %c1_28, %c0_29] : memref<3x20x10xf32, #tpu.memory_space<vmem>>, vector<1x8x8xf32>
    %55 = vector.shape_cast %54 : vector<1x8x8xf32> to vector<8x8xf32>
    %56 = vector.broadcast %53 : f32 to vector<8x8xf32>
    %57 = arith.mulf %55, %56 : vector<8x8xf32>
    %c10 = arith.constant 10 : index
    %58 = memref.load %arg1[%c10] : memref<40xf32, #tpu.memory_space<smem>>
    %c1_30 = arith.constant 1 : index
    %c1_31 = arith.constant 1 : index
    %c0_32 = arith.constant 0 : index
    %59 = vector.load %arg0[%c1_30, %c1_31, %c0_32] : memref<3x20x10xf32, #tpu.memory_space<vmem>>, vector<1x8x8xf32>
    %60 = vector.shape_cast %59 : vector<1x8x8xf32> to vector<8x8xf32>
    %61 = vector.broadcast %58 : f32 to vector<8x8xf32>
    %62 = arith.mulf %60, %61 : vector<8x8xf32>
    %63 = arith.addf %57, %62 : vector<8x8xf32>
    %c11 = arith.constant 11 : index
    %64 = memref.load %arg1[%c11] : memref<40xf32, #tpu.memory_space<smem>>
    %c2_33 = arith.constant 2 : index
    %c1_34 = arith.constant 1 : index
    %c0_35 = arith.constant 0 : index
    %65 = vector.load %arg0[%c2_33, %c1_34, %c0_35] : memref<3x20x10xf32, #tpu.memory_space<vmem>>, vector<1x8x8xf32>
    %66 = vector.shape_cast %65 : vector<1x8x8xf32> to vector<8x8xf32>
    %67 = vector.broadcast %64 : f32 to vector<8x8xf32>
    %68 = arith.mulf %66, %67 : vector<8x8xf32>
    %69 = arith.addf %63, %68 : vector<8x8xf32>
    %70 = arith.addf %52, %69 : vector<8x8xf32>
    %c12 = arith.constant 12 : index
    %71 = memref.load %arg1[%c12] : memref<40xf32, #tpu.memory_space<smem>>
    %c0_36 = arith.constant 0 : index
    %c1_37 = arith.constant 1 : index
    %c1_38 = arith.constant 1 : index
    %72 = vector.load %arg0[%c0_36, %c1_37, %c1_38] : memref<3x20x10xf32, #tpu.memory_space<vmem>>, vector<1x8x8xf32>
    %73 = vector.shape_cast %72 : vector<1x8x8xf32> to vector<8x8xf32>
    %74 = vector.broadcast %71 : f32 to vector<8x8xf32>
    %75 = arith.mulf %73, %74 : vector<8x8xf32>
    %c13 = arith.constant 13 : index
    %76 = memref.load %arg1[%c13] : memref<40xf32, #tpu.memory_space<smem>>
    %c1_39 = arith.constant 1 : index
    %c1_40 = arith.constant 1 : index
    %c1_41 = arith.constant 1 : index
    %77 = vector.load %arg0[%c1_39, %c1_40, %c1_41] : memref<3x20x10xf32, #tpu.memory_space<vmem>>, vector<1x8x8xf32>
    %78 = vector.shape_cast %77 : vector<1x8x8xf32> to vector<8x8xf32>
    %79 = vector.broadcast %76 : f32 to vector<8x8xf32>
    %80 = arith.mulf %78, %79 : vector<8x8xf32>
    %81 = arith.addf %75, %80 : vector<8x8xf32>
    %c14 = arith.constant 14 : index
    %82 = memref.load %arg1[%c14] : memref<40xf32, #tpu.memory_space<smem>>
    %c2_42 = arith.constant 2 : index
    %c1_43 = arith.constant 1 : index
    %c1_44 = arith.constant 1 : index
    %83 = vector.load %arg0[%c2_42, %c1_43, %c1_44] : memref<3x20x10xf32, #tpu.memory_space<vmem>>, vector<1x8x8xf32>
    %84 = vector.shape_cast %83 : vector<1x8x8xf32> to vector<8x8xf32>
    %85 = vector.broadcast %82 : f32 to vector<8x8xf32>
    %86 = arith.mulf %84, %85 : vector<8x8xf32>
    %87 = arith.addf %81, %86 : vector<8x8xf32>
    %88 = arith.addf %70, %87 : vector<8x8xf32>
    %c15 = arith.constant 15 : index
    %89 = memref.load %arg1[%c15] : memref<40xf32, #tpu.memory_space<smem>>
    %c0_45 = arith.constant 0 : index
    %c1_46 = arith.constant 1 : index
    %c2_47 = arith.constant 2 : index
    %90 = vector.load %arg0[%c0_45, %c1_46, %c2_47] : memref<3x20x10xf32, #tpu.memory_space<vmem>>, vector<1x8x8xf32>
    %91 = vector.shape_cast %90 : vector<1x8x8xf32> to vector<8x8xf32>
    %92 = vector.broadcast %89 : f32 to vector<8x8xf32>
    %93 = arith.mulf %91, %92 : vector<8x8xf32>
    %c16 = arith.constant 16 : index
    %94 = memref.load %arg1[%c16] : memref<40xf32, #tpu.memory_space<smem>>
    %c1_48 = arith.constant 1 : index
    %c1_49 = arith.constant 1 : index
    %c2_50 = arith.constant 2 : index
    %95 = vector.load %arg0[%c1_48, %c1_49, %c2_50] : memref<3x20x10xf32, #tpu.memory_space<vmem>>, vector<1x8x8xf32>
    %96 = vector.shape_cast %95 : vector<1x8x8xf32> to vector<8x8xf32>
    %97 = vector.broadcast %94 : f32 to vector<8x8xf32>
    %98 = arith.mulf %96, %97 : vector<8x8xf32>
    %99 = arith.addf %93, %98 : vector<8x8xf32>
    %c17 = arith.constant 17 : index
    %100 = memref.load %arg1[%c17] : memref<40xf32, #tpu.memory_space<smem>>
    %c2_51 = arith.constant 2 : index
    %c1_52 = arith.constant 1 : index
    %c2_53 = arith.constant 2 : index
    %101 = vector.load %arg0[%c2_51, %c1_52, %c2_53] : memref<3x20x10xf32, #tpu.memory_space<vmem>>, vector<1x8x8xf32>
    %102 = vector.shape_cast %101 : vector<1x8x8xf32> to vector<8x8xf32>
    %103 = vector.broadcast %100 : f32 to vector<8x8xf32>
    %104 = arith.mulf %102, %103 : vector<8x8xf32>
    %105 = arith.addf %99, %104 : vector<8x8xf32>
    %106 = arith.addf %88, %105 : vector<8x8xf32>
    %c18 = arith.constant 18 : index
    %107 = memref.load %arg1[%c18] : memref<40xf32, #tpu.memory_space<smem>>
    %c0_54 = arith.constant 0 : index
    %c2_55 = arith.constant 2 : index
    %c0_56 = arith.constant 0 : index
    %108 = vector.load %arg0[%c0_54, %c2_55, %c0_56] : memref<3x20x10xf32, #tpu.memory_space<vmem>>, vector<1x8x8xf32>
    %109 = vector.shape_cast %108 : vector<1x8x8xf32> to vector<8x8xf32>
    %110 = vector.broadcast %107 : f32 to vector<8x8xf32>
    %111 = arith.mulf %109, %110 : vector<8x8xf32>
    %c19 = arith.constant 19 : index
    %112 = memref.load %arg1[%c19] : memref<40xf32, #tpu.memory_space<smem>>
    %c1_57 = arith.constant 1 : index
    %c2_58 = arith.constant 2 : index
    %c0_59 = arith.constant 0 : index
    %113 = vector.load %arg0[%c1_57, %c2_58, %c0_59] : memref<3x20x10xf32, #tpu.memory_space<vmem>>, vector<1x8x8xf32>
    %114 = vector.shape_cast %113 : vector<1x8x8xf32> to vector<8x8xf32>
    %115 = vector.broadcast %112 : f32 to vector<8x8xf32>
    %116 = arith.mulf %114, %115 : vector<8x8xf32>
    %117 = arith.addf %111, %116 : vector<8x8xf32>
    %c20 = arith.constant 20 : index
    %118 = memref.load %arg1[%c20] : memref<40xf32, #tpu.memory_space<smem>>
    %c2_60 = arith.constant 2 : index
    %c2_61 = arith.constant 2 : index
    %c0_62 = arith.constant 0 : index
    %119 = vector.load %arg0[%c2_60, %c2_61, %c0_62] : memref<3x20x10xf32, #tpu.memory_space<vmem>>, vector<1x8x8xf32>
    %120 = vector.shape_cast %119 : vector<1x8x8xf32> to vector<8x8xf32>
    %121 = vector.broadcast %118 : f32 to vector<8x8xf32>
    %122 = arith.mulf %120, %121 : vector<8x8xf32>
    %123 = arith.addf %117, %122 : vector<8x8xf32>
    %124 = arith.addf %106, %123 : vector<8x8xf32>
    %c21 = arith.constant 21 : index
    %125 = memref.load %arg1[%c21] : memref<40xf32, #tpu.memory_space<smem>>
    %c0_63 = arith.constant 0 : index
    %c2_64 = arith.constant 2 : index
    %c1_65 = arith.constant 1 : index
    %126 = vector.load %arg0[%c0_63, %c2_64, %c1_65] : memref<3x20x10xf32, #tpu.memory_space<vmem>>, vector<1x8x8xf32>
    %127 = vector.shape_cast %126 : vector<1x8x8xf32> to vector<8x8xf32>
    %128 = vector.broadcast %125 : f32 to vector<8x8xf32>
    %129 = arith.mulf %127, %128 : vector<8x8xf32>
    %c22 = arith.constant 22 : index
    %130 = memref.load %arg1[%c22] : memref<40xf32, #tpu.memory_space<smem>>
    %c1_66 = arith.constant 1 : index
    %c2_67 = arith.constant 2 : index
    %c1_68 = arith.constant 1 : index
    %131 = vector.load %arg0[%c1_66, %c2_67, %c1_68] : memref<3x20x10xf32, #tpu.memory_space<vmem>>, vector<1x8x8xf32>
    %132 = vector.shape_cast %131 : vector<1x8x8xf32> to vector<8x8xf32>
    %133 = vector.broadcast %130 : f32 to vector<8x8xf32>
    %134 = arith.mulf %132, %133 : vector<8x8xf32>
    %135 = arith.addf %129, %134 : vector<8x8xf32>
    %c23 = arith.constant 23 : index
    %136 = memref.load %arg1[%c23] : memref<40xf32, #tpu.memory_space<smem>>
    %c2_69 = arith.constant 2 : index
    %c2_70 = arith.constant 2 : index
    %c1_71 = arith.constant 1 : index
    %137 = vector.load %arg0[%c2_69, %c2_70, %c1_71] : memref<3x20x10xf32, #tpu.memory_space<vmem>>, vector<1x8x8xf32>
    %138 = vector.shape_cast %137 : vector<1x8x8xf32> to vector<8x8xf32>
    %139 = vector.broadcast %136 : f32 to vector<8x8xf32>
    %140 = arith.mulf %138, %139 : vector<8x8xf32>
    %141 = arith.addf %135, %140 : vector<8x8xf32>
    %142 = arith.addf %124, %141 : vector<8x8xf32>
    %c24 = arith.constant 24 : index
    %143 = memref.load %arg1[%c24] : memref<40xf32, #tpu.memory_space<smem>>
    %c0_72 = arith.constant 0 : index
    %c2_73 = arith.constant 2 : index
    %c2_74 = arith.constant 2 : index
    %144 = vector.load %arg0[%c0_72, %c2_73, %c2_74] : memref<3x20x10xf32, #tpu.memory_space<vmem>>, vector<1x8x8xf32>
    %145 = vector.shape_cast %144 : vector<1x8x8xf32> to vector<8x8xf32>
    %146 = vector.broadcast %143 : f32 to vector<8x8xf32>
    %147 = arith.mulf %145, %146 : vector<8x8xf32>
    %c25 = arith.constant 25 : index
    %148 = memref.load %arg1[%c25] : memref<40xf32, #tpu.memory_space<smem>>
    %c1_75 = arith.constant 1 : index
    %c2_76 = arith.constant 2 : index
    %c2_77 = arith.constant 2 : index
    %149 = vector.load %arg0[%c1_75, %c2_76, %c2_77] : memref<3x20x10xf32, #tpu.memory_space<vmem>>, vector<1x8x8xf32>
    %150 = vector.shape_cast %149 : vector<1x8x8xf32> to vector<8x8xf32>
    %151 = vector.broadcast %148 : f32 to vector<8x8xf32>
    %152 = arith.mulf %150, %151 : vector<8x8xf32>
    %153 = arith.addf %147, %152 : vector<8x8xf32>
    %c26 = arith.constant 26 : index
    %154 = memref.load %arg1[%c26] : memref<40xf32, #tpu.memory_space<smem>>
    %c2_78 = arith.constant 2 : index
    %c2_79 = arith.constant 2 : index
    %c2_80 = arith.constant 2 : index
    %155 = vector.load %arg0[%c2_78, %c2_79, %c2_80] : memref<3x20x10xf32, #tpu.memory_space<vmem>>, vector<1x8x8xf32>
    %156 = vector.shape_cast %155 : vector<1x8x8xf32> to vector<8x8xf32>
    %157 = vector.broadcast %154 : f32 to vector<8x8xf32>
    %158 = arith.mulf %156, %157 : vector<8x8xf32>
    %159 = arith.addf %153, %158 : vector<8x8xf32>
    %160 = arith.addf %142, %159 : vector<8x8xf32>
    %c0_81 = arith.constant 0 : index
    %161 = memref.load %arg1[%c0_81] : memref<40xf32, #tpu.memory_space<smem>>
    %c0_82 = arith.constant 0 : index
    %c10_83 = arith.constant 10 : index
    %c0_84 = arith.constant 0 : index
    %162 = vector.load %arg0[%c0_82, %c10_83, %c0_84] : memref<3x20x10xf32, #tpu.memory_space<vmem>>, vector<1x8x8xf32>
    %163 = vector.shape_cast %162 : vector<1x8x8xf32> to vector<8x8xf32>
    %164 = vector.broadcast %161 : f32 to vector<8x8xf32>
    %165 = arith.mulf %163, %164 : vector<8x8xf32>
    %c1_85 = arith.constant 1 : index
    %166 = memref.load %arg1[%c1_85] : memref<40xf32, #tpu.memory_space<smem>>
    %c1_86 = arith.constant 1 : index
    %c10_87 = arith.constant 10 : index
    %c0_88 = arith.constant 0 : index
    %167 = vector.load %arg0[%c1_86, %c10_87, %c0_88] : memref<3x20x10xf32, #tpu.memory_space<vmem>>, vector<1x8x8xf32>
    %168 = vector.shape_cast %167 : vector<1x8x8xf32> to vector<8x8xf32>
    %169 = vector.broadcast %166 : f32 to vector<8x8xf32>
    %170 = arith.mulf %168, %169 : vector<8x8xf32>
    %171 = arith.addf %165, %170 : vector<8x8xf32>
    %c2_89 = arith.constant 2 : index
    %172 = memref.load %arg1[%c2_89] : memref<40xf32, #tpu.memory_space<smem>>
    %c2_90 = arith.constant 2 : index
    %c10_91 = arith.constant 10 : index
    %c0_92 = arith.constant 0 : index
    %173 = vector.load %arg0[%c2_90, %c10_91, %c0_92] : memref<3x20x10xf32, #tpu.memory_space<vmem>>, vector<1x8x8xf32>
    %174 = vector.shape_cast %173 : vector<1x8x8xf32> to vector<8x8xf32>
    %175 = vector.broadcast %172 : f32 to vector<8x8xf32>
    %176 = arith.mulf %174, %175 : vector<8x8xf32>
    %177 = arith.addf %171, %176 : vector<8x8xf32>
    %c3_93 = arith.constant 3 : index
    %178 = memref.load %arg1[%c3_93] : memref<40xf32, #tpu.memory_space<smem>>
    %c0_94 = arith.constant 0 : index
    %c10_95 = arith.constant 10 : index
    %c1_96 = arith.constant 1 : index
    %179 = vector.load %arg0[%c0_94, %c10_95, %c1_96] : memref<3x20x10xf32, #tpu.memory_space<vmem>>, vector<1x8x8xf32>
    %180 = vector.shape_cast %179 : vector<1x8x8xf32> to vector<8x8xf32>
    %181 = vector.broadcast %178 : f32 to vector<8x8xf32>
    %182 = arith.mulf %180, %181 : vector<8x8xf32>
    %c4_97 = arith.constant 4 : index
    %183 = memref.load %arg1[%c4_97] : memref<40xf32, #tpu.memory_space<smem>>
    %c1_98 = arith.constant 1 : index
    %c10_99 = arith.constant 10 : index
    %c1_100 = arith.constant 1 : index
    %184 = vector.load %arg0[%c1_98, %c10_99, %c1_100] : memref<3x20x10xf32, #tpu.memory_space<vmem>>, vector<1x8x8xf32>
    %185 = vector.shape_cast %184 : vector<1x8x8xf32> to vector<8x8xf32>
    %186 = vector.broadcast %183 : f32 to vector<8x8xf32>
    %187 = arith.mulf %185, %186 : vector<8x8xf32>
    %188 = arith.addf %182, %187 : vector<8x8xf32>
    %c5_101 = arith.constant 5 : index
    %189 = memref.load %arg1[%c5_101] : memref<40xf32, #tpu.memory_space<smem>>
    %c2_102 = arith.constant 2 : index
    %c10_103 = arith.constant 10 : index
    %c1_104 = arith.constant 1 : index
    %190 = vector.load %arg0[%c2_102, %c10_103, %c1_104] : memref<3x20x10xf32, #tpu.memory_space<vmem>>, vector<1x8x8xf32>
    %191 = vector.shape_cast %190 : vector<1x8x8xf32> to vector<8x8xf32>
    %192 = vector.broadcast %189 : f32 to vector<8x8xf32>
    %193 = arith.mulf %191, %192 : vector<8x8xf32>
    %194 = arith.addf %188, %193 : vector<8x8xf32>
    %195 = arith.addf %177, %194 : vector<8x8xf32>
    %c6_105 = arith.constant 6 : index
    %196 = memref.load %arg1[%c6_105] : memref<40xf32, #tpu.memory_space<smem>>
    %c0_106 = arith.constant 0 : index
    %c10_107 = arith.constant 10 : index
    %c2_108 = arith.constant 2 : index
    %197 = vector.load %arg0[%c0_106, %c10_107, %c2_108] : memref<3x20x10xf32, #tpu.memory_space<vmem>>, vector<1x8x8xf32>
    %198 = vector.shape_cast %197 : vector<1x8x8xf32> to vector<8x8xf32>
    %199 = vector.broadcast %196 : f32 to vector<8x8xf32>
    %200 = arith.mulf %198, %199 : vector<8x8xf32>
    %c7_109 = arith.constant 7 : index
    %201 = memref.load %arg1[%c7_109] : memref<40xf32, #tpu.memory_space<smem>>
    %c1_110 = arith.constant 1 : index
    %c10_111 = arith.constant 10 : index
    %c2_112 = arith.constant 2 : index
    %202 = vector.load %arg0[%c1_110, %c10_111, %c2_112] : memref<3x20x10xf32, #tpu.memory_space<vmem>>, vector<1x8x8xf32>
    %203 = vector.shape_cast %202 : vector<1x8x8xf32> to vector<8x8xf32>
    %204 = vector.broadcast %201 : f32 to vector<8x8xf32>
    %205 = arith.mulf %203, %204 : vector<8x8xf32>
    %206 = arith.addf %200, %205 : vector<8x8xf32>
    %c8_113 = arith.constant 8 : index
    %207 = memref.load %arg1[%c8_113] : memref<40xf32, #tpu.memory_space<smem>>
    %c2_114 = arith.constant 2 : index
    %c10_115 = arith.constant 10 : index
    %c2_116 = arith.constant 2 : index
    %208 = vector.load %arg0[%c2_114, %c10_115, %c2_116] : memref<3x20x10xf32, #tpu.memory_space<vmem>>, vector<1x8x8xf32>
    %209 = vector.shape_cast %208 : vector<1x8x8xf32> to vector<8x8xf32>
    %210 = vector.broadcast %207 : f32 to vector<8x8xf32>
    %211 = arith.mulf %209, %210 : vector<8x8xf32>
    %212 = arith.addf %206, %211 : vector<8x8xf32>
    %213 = arith.addf %195, %212 : vector<8x8xf32>
    %c9_117 = arith.constant 9 : index
    %214 = memref.load %arg1[%c9_117] : memref<40xf32, #tpu.memory_space<smem>>
    %c0_118 = arith.constant 0 : index
    %c11_119 = arith.constant 11 : index
    %c0_120 = arith.constant 0 : index
    %215 = vector.load %arg0[%c0_118, %c11_119, %c0_120] : memref<3x20x10xf32, #tpu.memory_space<vmem>>, vector<1x8x8xf32>
    %216 = vector.shape_cast %215 : vector<1x8x8xf32> to vector<8x8xf32>
    %217 = vector.broadcast %214 : f32 to vector<8x8xf32>
    %218 = arith.mulf %216, %217 : vector<8x8xf32>
    %c10_121 = arith.constant 10 : index
    %219 = memref.load %arg1[%c10_121] : memref<40xf32, #tpu.memory_space<smem>>
    %c1_122 = arith.constant 1 : index
    %c11_123 = arith.constant 11 : index
    %c0_124 = arith.constant 0 : index
    %220 = vector.load %arg0[%c1_122, %c11_123, %c0_124] : memref<3x20x10xf32, #tpu.memory_space<vmem>>, vector<1x8x8xf32>
    %221 = vector.shape_cast %220 : vector<1x8x8xf32> to vector<8x8xf32>
    %222 = vector.broadcast %219 : f32 to vector<8x8xf32>
    %223 = arith.mulf %221, %222 : vector<8x8xf32>
    %224 = arith.addf %218, %223 : vector<8x8xf32>
    %c11_125 = arith.constant 11 : index
    %225 = memref.load %arg1[%c11_125] : memref<40xf32, #tpu.memory_space<smem>>
    %c2_126 = arith.constant 2 : index
    %c11_127 = arith.constant 11 : index
    %c0_128 = arith.constant 0 : index
    %226 = vector.load %arg0[%c2_126, %c11_127, %c0_128] : memref<3x20x10xf32, #tpu.memory_space<vmem>>, vector<1x8x8xf32>
    %227 = vector.shape_cast %226 : vector<1x8x8xf32> to vector<8x8xf32>
    %228 = vector.broadcast %225 : f32 to vector<8x8xf32>
    %229 = arith.mulf %227, %228 : vector<8x8xf32>
    %230 = arith.addf %224, %229 : vector<8x8xf32>
    %231 = arith.addf %213, %230 : vector<8x8xf32>
    %c12_129 = arith.constant 12 : index
    %232 = memref.load %arg1[%c12_129] : memref<40xf32, #tpu.memory_space<smem>>
    %c0_130 = arith.constant 0 : index
    %c11_131 = arith.constant 11 : index
    %c1_132 = arith.constant 1 : index
    %233 = vector.load %arg0[%c0_130, %c11_131, %c1_132] : memref<3x20x10xf32, #tpu.memory_space<vmem>>, vector<1x8x8xf32>
    %234 = vector.shape_cast %233 : vector<1x8x8xf32> to vector<8x8xf32>
    %235 = vector.broadcast %232 : f32 to vector<8x8xf32>
    %236 = arith.mulf %234, %235 : vector<8x8xf32>
    %c13_133 = arith.constant 13 : index
    %237 = memref.load %arg1[%c13_133] : memref<40xf32, #tpu.memory_space<smem>>
    %c1_134 = arith.constant 1 : index
    %c11_135 = arith.constant 11 : index
    %c1_136 = arith.constant 1 : index
    %238 = vector.load %arg0[%c1_134, %c11_135, %c1_136] : memref<3x20x10xf32, #tpu.memory_space<vmem>>, vector<1x8x8xf32>
    %239 = vector.shape_cast %238 : vector<1x8x8xf32> to vector<8x8xf32>
    %240 = vector.broadcast %237 : f32 to vector<8x8xf32>
    %241 = arith.mulf %239, %240 : vector<8x8xf32>
    %242 = arith.addf %236, %241 : vector<8x8xf32>
    %c14_137 = arith.constant 14 : index
    %243 = memref.load %arg1[%c14_137] : memref<40xf32, #tpu.memory_space<smem>>
    %c2_138 = arith.constant 2 : index
    %c11_139 = arith.constant 11 : index
    %c1_140 = arith.constant 1 : index
    %244 = vector.load %arg0[%c2_138, %c11_139, %c1_140] : memref<3x20x10xf32, #tpu.memory_space<vmem>>, vector<1x8x8xf32>
    %245 = vector.shape_cast %244 : vector<1x8x8xf32> to vector<8x8xf32>
    %246 = vector.broadcast %243 : f32 to vector<8x8xf32>
    %247 = arith.mulf %245, %246 : vector<8x8xf32>
    %248 = arith.addf %242, %247 : vector<8x8xf32>
    %249 = arith.addf %231, %248 : vector<8x8xf32>
    %c15_141 = arith.constant 15 : index
    %250 = memref.load %arg1[%c15_141] : memref<40xf32, #tpu.memory_space<smem>>
    %c0_142 = arith.constant 0 : index
    %c11_143 = arith.constant 11 : index
    %c2_144 = arith.constant 2 : index
    %251 = vector.load %arg0[%c0_142, %c11_143, %c2_144] : memref<3x20x10xf32, #tpu.memory_space<vmem>>, vector<1x8x8xf32>
    %252 = vector.shape_cast %251 : vector<1x8x8xf32> to vector<8x8xf32>
    %253 = vector.broadcast %250 : f32 to vector<8x8xf32>
    %254 = arith.mulf %252, %253 : vector<8x8xf32>
    %c16_145 = arith.constant 16 : index
    %255 = memref.load %arg1[%c16_145] : memref<40xf32, #tpu.memory_space<smem>>
    %c1_146 = arith.constant 1 : index
    %c11_147 = arith.constant 11 : index
    %c2_148 = arith.constant 2 : index
    %256 = vector.load %arg0[%c1_146, %c11_147, %c2_148] : memref<3x20x10xf32, #tpu.memory_space<vmem>>, vector<1x8x8xf32>
    %257 = vector.shape_cast %256 : vector<1x8x8xf32> to vector<8x8xf32>
    %258 = vector.broadcast %255 : f32 to vector<8x8xf32>
    %259 = arith.mulf %257, %258 : vector<8x8xf32>
    %260 = arith.addf %254, %259 : vector<8x8xf32>
    %c17_149 = arith.constant 17 : index
    %261 = memref.load %arg1[%c17_149] : memref<40xf32, #tpu.memory_space<smem>>
    %c2_150 = arith.constant 2 : index
    %c11_151 = arith.constant 11 : index
    %c2_152 = arith.constant 2 : index
    %262 = vector.load %arg0[%c2_150, %c11_151, %c2_152] : memref<3x20x10xf32, #tpu.memory_space<vmem>>, vector<1x8x8xf32>
    %263 = vector.shape_cast %262 : vector<1x8x8xf32> to vector<8x8xf32>
    %264 = vector.broadcast %261 : f32 to vector<8x8xf32>
    %265 = arith.mulf %263, %264 : vector<8x8xf32>
    %266 = arith.addf %260, %265 : vector<8x8xf32>
    %267 = arith.addf %249, %266 : vector<8x8xf32>
    %c18_153 = arith.constant 18 : index
    %268 = memref.load %arg1[%c18_153] : memref<40xf32, #tpu.memory_space<smem>>
    %c0_154 = arith.constant 0 : index
    %c12_155 = arith.constant 12 : index
    %c0_156 = arith.constant 0 : index
    %269 = vector.load %arg0[%c0_154, %c12_155, %c0_156] : memref<3x20x10xf32, #tpu.memory_space<vmem>>, vector<1x8x8xf32>
    %270 = vector.shape_cast %269 : vector<1x8x8xf32> to vector<8x8xf32>
    %271 = vector.broadcast %268 : f32 to vector<8x8xf32>
    %272 = arith.mulf %270, %271 : vector<8x8xf32>
    %c19_157 = arith.constant 19 : index
    %273 = memref.load %arg1[%c19_157] : memref<40xf32, #tpu.memory_space<smem>>
    %c1_158 = arith.constant 1 : index
    %c12_159 = arith.constant 12 : index
    %c0_160 = arith.constant 0 : index
    %274 = vector.load %arg0[%c1_158, %c12_159, %c0_160] : memref<3x20x10xf32, #tpu.memory_space<vmem>>, vector<1x8x8xf32>
    %275 = vector.shape_cast %274 : vector<1x8x8xf32> to vector<8x8xf32>
    %276 = vector.broadcast %273 : f32 to vector<8x8xf32>
    %277 = arith.mulf %275, %276 : vector<8x8xf32>
    %278 = arith.addf %272, %277 : vector<8x8xf32>
    %c20_161 = arith.constant 20 : index
    %279 = memref.load %arg1[%c20_161] : memref<40xf32, #tpu.memory_space<smem>>
    %c2_162 = arith.constant 2 : index
    %c12_163 = arith.constant 12 : index
    %c0_164 = arith.constant 0 : index
    %280 = vector.load %arg0[%c2_162, %c12_163, %c0_164] : memref<3x20x10xf32, #tpu.memory_space<vmem>>, vector<1x8x8xf32>
    %281 = vector.shape_cast %280 : vector<1x8x8xf32> to vector<8x8xf32>
    %282 = vector.broadcast %279 : f32 to vector<8x8xf32>
    %283 = arith.mulf %281, %282 : vector<8x8xf32>
    %284 = arith.addf %278, %283 : vector<8x8xf32>
    %285 = arith.addf %267, %284 : vector<8x8xf32>
    %c21_165 = arith.constant 21 : index
    %286 = memref.load %arg1[%c21_165] : memref<40xf32, #tpu.memory_space<smem>>
    %c0_166 = arith.constant 0 : index
    %c12_167 = arith.constant 12 : index
    %c1_168 = arith.constant 1 : index
    %287 = vector.load %arg0[%c0_166, %c12_167, %c1_168] : memref<3x20x10xf32, #tpu.memory_space<vmem>>, vector<1x8x8xf32>
    %288 = vector.shape_cast %287 : vector<1x8x8xf32> to vector<8x8xf32>
    %289 = vector.broadcast %286 : f32 to vector<8x8xf32>
    %290 = arith.mulf %288, %289 : vector<8x8xf32>
    %c22_169 = arith.constant 22 : index
    %291 = memref.load %arg1[%c22_169] : memref<40xf32, #tpu.memory_space<smem>>
    %c1_170 = arith.constant 1 : index
    %c12_171 = arith.constant 12 : index
    %c1_172 = arith.constant 1 : index
    %292 = vector.load %arg0[%c1_170, %c12_171, %c1_172] : memref<3x20x10xf32, #tpu.memory_space<vmem>>, vector<1x8x8xf32>
    %293 = vector.shape_cast %292 : vector<1x8x8xf32> to vector<8x8xf32>
    %294 = vector.broadcast %291 : f32 to vector<8x8xf32>
    %295 = arith.mulf %293, %294 : vector<8x8xf32>
    %296 = arith.addf %290, %295 : vector<8x8xf32>
    %c23_173 = arith.constant 23 : index
    %297 = memref.load %arg1[%c23_173] : memref<40xf32, #tpu.memory_space<smem>>
    %c2_174 = arith.constant 2 : index
    %c12_175 = arith.constant 12 : index
    %c1_176 = arith.constant 1 : index
    %298 = vector.load %arg0[%c2_174, %c12_175, %c1_176] : memref<3x20x10xf32, #tpu.memory_space<vmem>>, vector<1x8x8xf32>
    %299 = vector.shape_cast %298 : vector<1x8x8xf32> to vector<8x8xf32>
    %300 = vector.broadcast %297 : f32 to vector<8x8xf32>
    %301 = arith.mulf %299, %300 : vector<8x8xf32>
    %302 = arith.addf %296, %301 : vector<8x8xf32>
    %303 = arith.addf %285, %302 : vector<8x8xf32>
    %c24_177 = arith.constant 24 : index
    %304 = memref.load %arg1[%c24_177] : memref<40xf32, #tpu.memory_space<smem>>
    %c0_178 = arith.constant 0 : index
    %c12_179 = arith.constant 12 : index
    %c2_180 = arith.constant 2 : index
    %305 = vector.load %arg0[%c0_178, %c12_179, %c2_180] : memref<3x20x10xf32, #tpu.memory_space<vmem>>, vector<1x8x8xf32>
    %306 = vector.shape_cast %305 : vector<1x8x8xf32> to vector<8x8xf32>
    %307 = vector.broadcast %304 : f32 to vector<8x8xf32>
    %308 = arith.mulf %306, %307 : vector<8x8xf32>
    %c25_181 = arith.constant 25 : index
    %309 = memref.load %arg1[%c25_181] : memref<40xf32, #tpu.memory_space<smem>>
    %c1_182 = arith.constant 1 : index
    %c12_183 = arith.constant 12 : index
    %c2_184 = arith.constant 2 : index
    %310 = vector.load %arg0[%c1_182, %c12_183, %c2_184] : memref<3x20x10xf32, #tpu.memory_space<vmem>>, vector<1x8x8xf32>
    %311 = vector.shape_cast %310 : vector<1x8x8xf32> to vector<8x8xf32>
    %312 = vector.broadcast %309 : f32 to vector<8x8xf32>
    %313 = arith.mulf %311, %312 : vector<8x8xf32>
    %314 = arith.addf %308, %313 : vector<8x8xf32>
    %c26_185 = arith.constant 26 : index
    %315 = memref.load %arg1[%c26_185] : memref<40xf32, #tpu.memory_space<smem>>
    %c2_186 = arith.constant 2 : index
    %c12_187 = arith.constant 12 : index
    %c2_188 = arith.constant 2 : index
    %316 = vector.load %arg0[%c2_186, %c12_187, %c2_188] : memref<3x20x10xf32, #tpu.memory_space<vmem>>, vector<1x8x8xf32>
    %317 = vector.shape_cast %316 : vector<1x8x8xf32> to vector<8x8xf32>
    %318 = vector.broadcast %315 : f32 to vector<8x8xf32>
    %319 = arith.mulf %317, %318 : vector<8x8xf32>
    %320 = arith.addf %314, %319 : vector<8x8xf32>
    %321 = arith.addf %303, %320 : vector<8x8xf32>
    %c36 = arith.constant 36 : index
    %322 = memref.load %arg1[%c36] : memref<40xf32, #tpu.memory_space<smem>>
    %c37 = arith.constant 37 : index
    %323 = memref.load %arg1[%c37] : memref<40xf32, #tpu.memory_space<smem>>
    %324 = vector.shape_cast %160 : vector<8x8xf32> to vector<1x8x8xf32>
    %cst = arith.constant dense<0.000000e+00> : vector<1xf32>
    %325 = vector.multi_reduction <add>, %324, %cst [1, 2] : vector<1x8x8xf32> to vector<1xf32>
    %326 = vector.shape_cast %325 : vector<1xf32> to vector<1x1x1xf32>
    %327 = vector.extract %326[0, 0, 0] : f32 from vector<1x1x1xf32>
    %328 = vector.shape_cast %321 : vector<8x8xf32> to vector<1x8x8xf32>
    %cst_189 = arith.constant dense<0.000000e+00> : vector<1xf32>
    %329 = vector.multi_reduction <add>, %328, %cst_189 [1, 2] : vector<1x8x8xf32> to vector<1xf32>
    %330 = vector.shape_cast %329 : vector<1xf32> to vector<1x1x1xf32>
    %331 = vector.extract %330[0, 0, 0] : f32 from vector<1x1x1xf32>
    %332 = arith.addf %327, %331 : f32
    %cst_190 = arith.constant 7.812500e-03 : f32
    %333 = arith.mulf %332, %cst_190 : f32
    %334 = vector.broadcast %333 : f32 to vector<8x8xf32>
    %335 = arith.subf %160, %334 : vector<8x8xf32>
    %336 = arith.mulf %335, %335 : vector<8x8xf32>
    %337 = vector.shape_cast %336 : vector<8x8xf32> to vector<1x8x8xf32>
    %cst_191 = arith.constant dense<0.000000e+00> : vector<1xf32>
    %338 = vector.multi_reduction <add>, %337, %cst_191 [1, 2] : vector<1x8x8xf32> to vector<1xf32>
    %339 = vector.shape_cast %338 : vector<1xf32> to vector<1x1x1xf32>
    %340 = vector.extract %339[0, 0, 0] : f32 from vector<1x1x1xf32>
    %341 = vector.broadcast %333 : f32 to vector<8x8xf32>
    %342 = arith.subf %321, %341 : vector<8x8xf32>
    %343 = arith.mulf %342, %342 : vector<8x8xf32>
    %344 = vector.shape_cast %343 : vector<8x8xf32> to vector<1x8x8xf32>
    %cst_192 = arith.constant dense<0.000000e+00> : vector<1xf32>
    %345 = vector.multi_reduction <add>, %344, %cst_192 [1, 2] : vector<1x8x8xf32> to vector<1xf32>
    %346 = vector.shape_cast %345 : vector<1xf32> to vector<1x1x1xf32>
    %347 = vector.extract %346[0, 0, 0] : f32 from vector<1x1x1xf32>
    %348 = arith.addf %340, %347 : f32
    %cst_193 = arith.constant 7.812500e-03 : f32
    %349 = arith.mulf %348, %cst_193 : f32
    %cst_194 = arith.constant 9.99999974E-6 : f32
    %350 = arith.addf %349, %cst_194 : f32
    %351 = math.rsqrt %350 : f32
    %352 = arith.mulf %322, %351 : f32
    %353 = arith.mulf %333, %352 : f32
    %354 = arith.subf %323, %353 : f32
    %cst_195 = arith.constant 0.000000e+00 : f32
    %355 = vector.broadcast %cst_195 : f32 to vector<20x10xf32>
    %c0_196 = arith.constant 0 : index
    %c0_197 = arith.constant 0 : index
    %356 = vector.load %arg3[%c0_196, %c0_197] : memref<20x10xf32, #tpu.memory_space<vmem>>, vector<20x10xf32>
    tpu.vector_store %arg3[%c0_196, %c0_197], %355 {strides = array<i32>} : memref<20x10xf32, #tpu.memory_space<vmem>>, vector<20x10xf32>,
    %357 = vector.broadcast %352 : f32 to vector<8x8xf32>
    %358 = arith.mulf %160, %357 : vector<8x8xf32>
    %359 = vector.broadcast %354 : f32 to vector<8x8xf32>
    %360 = arith.addf %358, %359 : vector<8x8xf32>
    %cst_198 = arith.constant 0.000000e+00 : f32
    %361 = vector.broadcast %cst_198 : f32 to vector<8x8xf32>
    %362 = arith.maximumf %360, %361 : vector<8x8xf32>
    %c1_199 = arith.constant 1 : index
    %c1_200 = arith.constant 1 : index
    %363 = vector.load %arg3[%c1_199, %c1_200] : memref<20x10xf32, #tpu.memory_space<vmem>>, vector<8x8xf32>
    tpu.vector_store %arg3[%c1_199, %c1_200], %362 {strides = array<i32>} : memref<20x10xf32, #tpu.memory_space<vmem>>, vector<8x8xf32>,
    %364 = vector.broadcast %352 : f32 to vector<8x8xf32>
    %365 = arith.mulf %321, %364 : vector<8x8xf32>
    %366 = vector.broadcast %354 : f32 to vector<8x8xf32>
    %367 = arith.addf %365, %366 : vector<8x8xf32>
    %cst_201 = arith.constant 0.000000e+00 : f32
    %368 = vector.broadcast %cst_201 : f32 to vector<8x8xf32>
    %369 = arith.maximumf %367, %368 : vector<8x8xf32>
    %c11_202 = arith.constant 11 : index
    %c1_203 = arith.constant 1 : index
    %370 = vector.load %arg3[%c11_202, %c1_203] : memref<20x10xf32, #tpu.memory_space<vmem>>, vector<8x8xf32>
    tpu.vector_store %arg3[%c11_202, %c1_203], %369 {strides = array<i32>} : memref<20x10xf32, #tpu.memory_space<vmem>>, vector<8x8xf32>,
    %c27 = arith.constant 27 : index
    %371 = memref.load %arg1[%c27] : memref<40xf32, #tpu.memory_space<smem>>
    %c0_204 = arith.constant 0 : index
    %c0_205 = arith.constant 0 : index
    %372 = vector.load %arg3[%c0_204, %c0_205] : memref<20x10xf32, #tpu.memory_space<vmem>>, vector<8x8xf32>
    %373 = vector.broadcast %371 : f32 to vector<8x8xf32>
    %374 = arith.mulf %372, %373 : vector<8x8xf32>
    %c28 = arith.constant 28 : index
    %375 = memref.load %arg1[%c28] : memref<40xf32, #tpu.memory_space<smem>>
    %c0_206 = arith.constant 0 : index
    %c1_207 = arith.constant 1 : index
    %376 = vector.load %arg3[%c0_206, %c1_207] : memref<20x10xf32, #tpu.memory_space<vmem>>, vector<8x8xf32>
    %377 = vector.broadcast %375 : f32 to vector<8x8xf32>
    %378 = arith.mulf %376, %377 : vector<8x8xf32>
    %379 = arith.addf %374, %378 : vector<8x8xf32>
    %c29 = arith.constant 29 : index
    %380 = memref.load %arg1[%c29] : memref<40xf32, #tpu.memory_space<smem>>
    %c0_208 = arith.constant 0 : index
    %c2_209 = arith.constant 2 : index
    %381 = vector.load %arg3[%c0_208, %c2_209] : memref<20x10xf32, #tpu.memory_space<vmem>>, vector<8x8xf32>
    %382 = vector.broadcast %380 : f32 to vector<8x8xf32>
    %383 = arith.mulf %381, %382 : vector<8x8xf32>
    %384 = arith.addf %379, %383 : vector<8x8xf32>
    %c30 = arith.constant 30 : index
    %385 = memref.load %arg1[%c30] : memref<40xf32, #tpu.memory_space<smem>>
    %c1_210 = arith.constant 1 : index
    %c0_211 = arith.constant 0 : index
    %386 = vector.load %arg3[%c1_210, %c0_211] : memref<20x10xf32, #tpu.memory_space<vmem>>, vector<8x8xf32>
    %387 = vector.broadcast %385 : f32 to vector<8x8xf32>
    %388 = arith.mulf %386, %387 : vector<8x8xf32>
    %389 = arith.addf %384, %388 : vector<8x8xf32>
    %c31 = arith.constant 31 : index
    %390 = memref.load %arg1[%c31] : memref<40xf32, #tpu.memory_space<smem>>
    %c1_212 = arith.constant 1 : index
    %c1_213 = arith.constant 1 : index
    %391 = vector.load %arg3[%c1_212, %c1_213] : memref<20x10xf32, #tpu.memory_space<vmem>>, vector<8x8xf32>
    %392 = vector.broadcast %390 : f32 to vector<8x8xf32>
    %393 = arith.mulf %391, %392 : vector<8x8xf32>
    %394 = arith.addf %389, %393 : vector<8x8xf32>
    %c32 = arith.constant 32 : index
    %395 = memref.load %arg1[%c32] : memref<40xf32, #tpu.memory_space<smem>>
    %c1_214 = arith.constant 1 : index
    %c2_215 = arith.constant 2 : index
    %396 = vector.load %arg3[%c1_214, %c2_215] : memref<20x10xf32, #tpu.memory_space<vmem>>, vector<8x8xf32>
    %397 = vector.broadcast %395 : f32 to vector<8x8xf32>
    %398 = arith.mulf %396, %397 : vector<8x8xf32>
    %399 = arith.addf %394, %398 : vector<8x8xf32>
    %c33 = arith.constant 33 : index
    %400 = memref.load %arg1[%c33] : memref<40xf32, #tpu.memory_space<smem>>
    %c2_216 = arith.constant 2 : index
    %c0_217 = arith.constant 0 : index
    %401 = vector.load %arg3[%c2_216, %c0_217] : memref<20x10xf32, #tpu.memory_space<vmem>>, vector<8x8xf32>
    %402 = vector.broadcast %400 : f32 to vector<8x8xf32>
    %403 = arith.mulf %401, %402 : vector<8x8xf32>
    %404 = arith.addf %399, %403 : vector<8x8xf32>
    %c34 = arith.constant 34 : index
    %405 = memref.load %arg1[%c34] : memref<40xf32, #tpu.memory_space<smem>>
    %c2_218 = arith.constant 2 : index
    %c1_219 = arith.constant 1 : index
    %406 = vector.load %arg3[%c2_218, %c1_219] : memref<20x10xf32, #tpu.memory_space<vmem>>, vector<8x8xf32>
    %407 = vector.broadcast %405 : f32 to vector<8x8xf32>
    %408 = arith.mulf %406, %407 : vector<8x8xf32>
    %409 = arith.addf %404, %408 : vector<8x8xf32>
    %c35 = arith.constant 35 : index
    %410 = memref.load %arg1[%c35] : memref<40xf32, #tpu.memory_space<smem>>
    %c2_220 = arith.constant 2 : index
    %c2_221 = arith.constant 2 : index
    %411 = vector.load %arg3[%c2_220, %c2_221] : memref<20x10xf32, #tpu.memory_space<vmem>>, vector<8x8xf32>
    %412 = vector.broadcast %410 : f32 to vector<8x8xf32>
    %413 = arith.mulf %411, %412 : vector<8x8xf32>
    %414 = arith.addf %409, %413 : vector<8x8xf32>
    %c27_222 = arith.constant 27 : index
    %415 = memref.load %arg1[%c27_222] : memref<40xf32, #tpu.memory_space<smem>>
    %c10_223 = arith.constant 10 : index
    %c0_224 = arith.constant 0 : index
    %416 = vector.load %arg3[%c10_223, %c0_224] : memref<20x10xf32, #tpu.memory_space<vmem>>, vector<8x8xf32>
    %417 = vector.broadcast %415 : f32 to vector<8x8xf32>
    %418 = arith.mulf %416, %417 : vector<8x8xf32>
    %c28_225 = arith.constant 28 : index
    %419 = memref.load %arg1[%c28_225] : memref<40xf32, #tpu.memory_space<smem>>
    %c10_226 = arith.constant 10 : index
    %c1_227 = arith.constant 1 : index
    %420 = vector.load %arg3[%c10_226, %c1_227] : memref<20x10xf32, #tpu.memory_space<vmem>>, vector<8x8xf32>
    %421 = vector.broadcast %419 : f32 to vector<8x8xf32>
    %422 = arith.mulf %420, %421 : vector<8x8xf32>
    %423 = arith.addf %418, %422 : vector<8x8xf32>
    %c29_228 = arith.constant 29 : index
    %424 = memref.load %arg1[%c29_228] : memref<40xf32, #tpu.memory_space<smem>>
    %c10_229 = arith.constant 10 : index
    %c2_230 = arith.constant 2 : index
    %425 = vector.load %arg3[%c10_229, %c2_230] : memref<20x10xf32, #tpu.memory_space<vmem>>, vector<8x8xf32>
    %426 = vector.broadcast %424 : f32 to vector<8x8xf32>
    %427 = arith.mulf %425, %426 : vector<8x8xf32>
    %428 = arith.addf %423, %427 : vector<8x8xf32>
    %c30_231 = arith.constant 30 : index
    %429 = memref.load %arg1[%c30_231] : memref<40xf32, #tpu.memory_space<smem>>
    %c11_232 = arith.constant 11 : index
    %c0_233 = arith.constant 0 : index
    %430 = vector.load %arg3[%c11_232, %c0_233] : memref<20x10xf32, #tpu.memory_space<vmem>>, vector<8x8xf32>
    %431 = vector.broadcast %429 : f32 to vector<8x8xf32>
    %432 = arith.mulf %430, %431 : vector<8x8xf32>
    %433 = arith.addf %428, %432 : vector<8x8xf32>
    %c31_234 = arith.constant 31 : index
    %434 = memref.load %arg1[%c31_234] : memref<40xf32, #tpu.memory_space<smem>>
    %c11_235 = arith.constant 11 : index
    %c1_236 = arith.constant 1 : index
    %435 = vector.load %arg3[%c11_235, %c1_236] : memref<20x10xf32, #tpu.memory_space<vmem>>, vector<8x8xf32>
    %436 = vector.broadcast %434 : f32 to vector<8x8xf32>
    %437 = arith.mulf %435, %436 : vector<8x8xf32>
    %438 = arith.addf %433, %437 : vector<8x8xf32>
    %c32_237 = arith.constant 32 : index
    %439 = memref.load %arg1[%c32_237] : memref<40xf32, #tpu.memory_space<smem>>
    %c11_238 = arith.constant 11 : index
    %c2_239 = arith.constant 2 : index
    %440 = vector.load %arg3[%c11_238, %c2_239] : memref<20x10xf32, #tpu.memory_space<vmem>>, vector<8x8xf32>
    %441 = vector.broadcast %439 : f32 to vector<8x8xf32>
    %442 = arith.mulf %440, %441 : vector<8x8xf32>
    %443 = arith.addf %438, %442 : vector<8x8xf32>
    %c33_240 = arith.constant 33 : index
    %444 = memref.load %arg1[%c33_240] : memref<40xf32, #tpu.memory_space<smem>>
    %c12_241 = arith.constant 12 : index
    %c0_242 = arith.constant 0 : index
    %445 = vector.load %arg3[%c12_241, %c0_242] : memref<20x10xf32, #tpu.memory_space<vmem>>, vector<8x8xf32>
    %446 = vector.broadcast %444 : f32 to vector<8x8xf32>
    %447 = arith.mulf %445, %446 : vector<8x8xf32>
    %448 = arith.addf %443, %447 : vector<8x8xf32>
    %c34_243 = arith.constant 34 : index
    %449 = memref.load %arg1[%c34_243] : memref<40xf32, #tpu.memory_space<smem>>
    %c12_244 = arith.constant 12 : index
    %c1_245 = arith.constant 1 : index
    %450 = vector.load %arg3[%c12_244, %c1_245] : memref<20x10xf32, #tpu.memory_space<vmem>>, vector<8x8xf32>
    %451 = vector.broadcast %449 : f32 to vector<8x8xf32>
    %452 = arith.mulf %450, %451 : vector<8x8xf32>
    %453 = arith.addf %448, %452 : vector<8x8xf32>
    %c35_246 = arith.constant 35 : index
    %454 = memref.load %arg1[%c35_246] : memref<40xf32, #tpu.memory_space<smem>>
    %c12_247 = arith.constant 12 : index
    %c2_248 = arith.constant 2 : index
    %455 = vector.load %arg3[%c12_247, %c2_248] : memref<20x10xf32, #tpu.memory_space<vmem>>, vector<8x8xf32>
    %456 = vector.broadcast %454 : f32 to vector<8x8xf32>
    %457 = arith.mulf %455, %456 : vector<8x8xf32>
    %458 = arith.addf %453, %457 : vector<8x8xf32>
    %c38 = arith.constant 38 : index
    %459 = memref.load %arg1[%c38] : memref<40xf32, #tpu.memory_space<smem>>
    %c39 = arith.constant 39 : index
    %460 = memref.load %arg1[%c39] : memref<40xf32, #tpu.memory_space<smem>>
    %461 = vector.shape_cast %414 : vector<8x8xf32> to vector<1x8x8xf32>
    %cst_249 = arith.constant dense<0.000000e+00> : vector<1xf32>
    %462 = vector.multi_reduction <add>, %461, %cst_249 [1, 2] : vector<1x8x8xf32> to vector<1xf32>
    %463 = vector.shape_cast %462 : vector<1xf32> to vector<1x1x1xf32>
    %464 = vector.extract %463[0, 0, 0] : f32 from vector<1x1x1xf32>
    %465 = vector.shape_cast %458 : vector<8x8xf32> to vector<1x8x8xf32>
    %cst_250 = arith.constant dense<0.000000e+00> : vector<1xf32>
    %466 = vector.multi_reduction <add>, %465, %cst_250 [1, 2] : vector<1x8x8xf32> to vector<1xf32>
    %467 = vector.shape_cast %466 : vector<1xf32> to vector<1x1x1xf32>
    %468 = vector.extract %467[0, 0, 0] : f32 from vector<1x1x1xf32>
    %469 = arith.addf %464, %468 : f32
    %cst_251 = arith.constant 7.812500e-03 : f32
    %470 = arith.mulf %469, %cst_251 : f32
    %471 = vector.broadcast %470 : f32 to vector<8x8xf32>
    %472 = arith.subf %414, %471 : vector<8x8xf32>
    %473 = arith.mulf %472, %472 : vector<8x8xf32>
    %474 = vector.shape_cast %473 : vector<8x8xf32> to vector<1x8x8xf32>
    %cst_252 = arith.constant dense<0.000000e+00> : vector<1xf32>
    %475 = vector.multi_reduction <add>, %474, %cst_252 [1, 2] : vector<1x8x8xf32> to vector<1xf32>
    %476 = vector.shape_cast %475 : vector<1xf32> to vector<1x1x1xf32>
    %477 = vector.extract %476[0, 0, 0] : f32 from vector<1x1x1xf32>
    %478 = vector.broadcast %470 : f32 to vector<8x8xf32>
    %479 = arith.subf %458, %478 : vector<8x8xf32>
    %480 = arith.mulf %479, %479 : vector<8x8xf32>
    %481 = vector.shape_cast %480 : vector<8x8xf32> to vector<1x8x8xf32>
    %cst_253 = arith.constant dense<0.000000e+00> : vector<1xf32>
    %482 = vector.multi_reduction <add>, %481, %cst_253 [1, 2] : vector<1x8x8xf32> to vector<1xf32>
    %483 = vector.shape_cast %482 : vector<1xf32> to vector<1x1x1xf32>
    %484 = vector.extract %483[0, 0, 0] : f32 from vector<1x1x1xf32>
    %485 = arith.addf %477, %484 : f32
    %cst_254 = arith.constant 7.812500e-03 : f32
    %486 = arith.mulf %485, %cst_254 : f32
    %cst_255 = arith.constant 9.99999974E-6 : f32
    %487 = arith.addf %486, %cst_255 : f32
    %488 = math.rsqrt %487 : f32
    %489 = arith.mulf %459, %488 : f32
    %490 = arith.mulf %470, %489 : f32
    %491 = arith.subf %460, %490 : f32
    %492 = vector.broadcast %489 : f32 to vector<8x8xf32>
    %493 = arith.mulf %414, %492 : vector<8x8xf32>
    %494 = vector.broadcast %491 : f32 to vector<8x8xf32>
    %495 = arith.addf %493, %494 : vector<8x8xf32>
    %cst_256 = arith.constant 0.000000e+00 : f32
    %496 = vector.broadcast %cst_256 : f32 to vector<8x8xf32>
    %497 = arith.maximumf %495, %496 : vector<8x8xf32>
    %c0_257 = arith.constant 0 : index
    %c0_258 = arith.constant 0 : index
    %498 = vector.load %arg2[%c0_257, %c0_258] : memref<16x8xf32, #tpu.memory_space<vmem>>, vector<8x8xf32>
    tpu.vector_store %arg2[%c0_257, %c0_258], %497 {strides = array<i32>} : memref<16x8xf32, #tpu.memory_space<vmem>>, vector<8x8xf32>,
    %499 = vector.broadcast %489 : f32 to vector<8x8xf32>
    %500 = arith.mulf %458, %499 : vector<8x8xf32>
    %501 = vector.broadcast %491 : f32 to vector<8x8xf32>
    %502 = arith.addf %500, %501 : vector<8x8xf32>
    %cst_259 = arith.constant 0.000000e+00 : f32
    %503 = vector.broadcast %cst_259 : f32 to vector<8x8xf32>
    %504 = arith.maximumf %502, %503 : vector<8x8xf32>
    %c8_260 = arith.constant 8 : index
    %c0_261 = arith.constant 0 : index
    %505 = vector.load %arg2[%c8_260, %c0_261] : memref<16x8xf32, #tpu.memory_space<vmem>>, vector<8x8xf32>
    tpu.vector_store %arg2[%c8_260, %c0_261], %504 {strides = array<i32>} : memref<16x8xf32, #tpu.memory_space<vmem>>, vector<8x8xf32>,
    return
  }
}

</mosaic_0001>

<bundles_post_ra>
// kernel: down_forward.1
= control target key start
LH: loop header
LB: loop body
LE: loop exit
PB: predicated region body
PF: predicated region fallthrough
CT: control target
= control target key end

     0   :  { %7 = vsyncpa [#allocation5], 0  ;;  %s956_s0 = inlined_call_operand.vmem [shape: f32[3,20,10], index: 0, kind: input, shape index: {}]   ;;  %s957_s1 = inlined_call_operand.vmem [shape: f32[40], index: 1, kind: input, shape index: {}]   ;;  %s958_s2 = inlined_call_operand.hbm [shape: f32[16,8], index: 2, kind: output, shape index: {}]  }
   0x1   :  { %8 = vsyncpa [#allocation4], 0  ;;  %s16_s11 = sshll.u32 %s957_s1, 4  ;;  %s670_s12 = smov [#allocation3]   ;;  %s17_s11 = int_to_ptr.vmem [resolvable:$true] %s16_s11 }
   0x2   :  { %19 = dma.vmem_to_smem %s17_s11, 16, %s670_s12, [#allocation5]  }
   0x3   :  { %666 = dma.done.wait [#allocation5], 16  }
   0x4   :  { %667 = vsyncadd [#allocation5], 4294967280 }
   0x5   :  { %24 = sfence }
   0x6   :  { %s554_s13 = sld [smem:[#allocation3 + $0x6]]  ;;  %v701_v0 = vld [vmem:[%s956_s0] sm:$0xff]  ;;  %v706_v1 = vld [vmem:[%s956_s0 + $0x18] sm:$0xff]  ;;  %v713_v2 = vld [vmem:[%s956_s0 + $0x30] sm:$0xff]  ;;  %s671_s7 = smov 126   ;;  %vm255_vm0 = vcmask 64512  }
   0x7   :  { %s555_s14 = sld [smem:[#allocation3 + $0x7]]  ;;  %v718_v4 = vld [vmem:[%s956_s0 + $0xa] sm:$0xff]  ;;  %v726_v7 = vld [vmem:[%s956_s0 + $0x22] sm:$0xff]  ;;  %v741_v17 = vld [vmem:[%s956_s0 + $0x3a] sm:$0xff]  ;;  %vm321_vm4 = vcmask 80896   ;;  %vm324_vm5 = vcmask 76800  }
   0x8   :  { %s696_s15 = sld [smem:[#allocation3 + $0x8]]  ;;  %v761_v30 = vld [vmem:[%s956_s0 + $0xb] sm:$0xff]  ;;  %v766_v31 = vld [vmem:[%s956_s0 + $0x23] sm:$0xff]  ;;  %v782_v35 = vld [vmem:[%s956_s0 + $0x19] sm:$0xff]  ;;  %s674_s9 = smov 1   ;;  %vm335_vm6 = vcmask 72712  }
   0x9   :  { %s551_s16 = sld [smem:[#allocation3 + $0x3]]  ;;  %v777_v34 = vld [vmem:[%s956_s0 + $0x1] sm:$0xff]  ;;  %v804_v45 = vld [vmem:[%s956_s0 + $0x31] sm:$0xff] }
   0xa   :  { %s552_s19 = sld [smem:[#allocation3 + $0x4]]  ;;  %v790_v38 = vld [vmem:[%s956_s0 + $0x3b] sm:$0xff] }
   0xb   :  { %s708_s21 = sld [smem:[#allocation3 + $0x5]]  ;;  %v811_v48 = vld [vmem:[%s956_s0 + $0x2] sm:$0xff]  ;;  %v821_v52 = vld [vmem:[%s956_s0 + $0x1a] sm:$0xff] }
   0xc   :  { %v58_v3 = vstv %s554_s13  ;;  %s720_s26 = sld [smem:[#allocation3 + $0xf]] }
   0xd   :  { %v59_v5 = vmul.f32 %v58_v3, %v701_v0  ;;  %v61_v6 = vstv %s555_s14  ;;  %s728_s29 = sld [smem:[#allocation3 + $0x10]]  ;;  %v185_v11 = vmul.f32 %v718_v4, %v58_v3 }
   0xe   :  { %v62_v8 = vmul.f32 %v706_v1, %v61_v6  ;;  %v65_v9 = vstv %s696_s15  ;;  %v186_v14 = vmul.f32 %v726_v7, %v61_v6  ;;  %s736_s30 = sld [smem:[#allocation3 + $0x11]]  ;;  %s672_s15 = smov 127  }
   0xf   :  { %v66_v10 = vmul.f32 %v713_v2, %v65_v9  ;;  %v42_v12 = vstv %s551_s16  ;;  %s746_s5 = sld [smem:[#allocation3 + $0x18]]  ;;  %v188_v25 = vmul.f32 %v741_v17, %v65_v9  ;;  %v843_v9 = vld [vmem:[%s956_s0 + $0x24] sm:$0xff] }
  0x10   :  { %v63_v13 = vadd.f32 %v62_v8, %v59_v5  ;;  %v43_v15 = vmul.f32 %v42_v12, %v701_v0  ;;  %v45_v16 = vstv %s552_s19  ;;  %v175_v23 = vmul.f32 %v718_v4, %v42_v12  ;;  %s750_s6 = sld [smem:[#allocation3 + $0x19]]  ;;  %v838_v8 = vld [vmem:[%s956_s0 + $0xc] sm:$0xff] }
  0x11   :  { %v46_v18 = vmul.f32 %v706_v1, %v45_v16  ;;  %v49_v19 = vstv %s708_s21  ;;  %v176_v24 = vmul.f32 %v726_v7, %v45_v16  ;;  %v187_v26 = vadd.f32 %v186_v14, %v185_v11  ;;  %s754_s8 = sld [smem:[#allocation3 + $0x15]] }
  0x12   :  { %v67_v20 = vadd.f32 %v66_v10, %v63_v13  ;;  %v50_v21 = vmul.f32 %v713_v2, %v49_v19  ;;  %v105_v28 = vstv %s720_s26  ;;  %s768_s13 = sld [smem:[#allocation3 + $0xc]]  ;;  %v178_v32 = vmul.f32 %v741_v17, %v49_v19  ;;  %v848_v10 = vld [vmem:[%s956_s0 + $0x32] sm:$0xff] }
  0x13   :  { %v47_v22 = vadd.f32 %v46_v18, %v43_v15  ;;  %v108_v29 = vstv %s728_s29  ;;  %s770_s14 = sld [smem:[#allocation3 + $0xd]]  ;;  %v177_v33 = vadd.f32 %v176_v24, %v175_v23  ;;  %v189_v36 = vadd.f32 %v188_v25, %v187_v26 }
  0x14   :  { %69 = vrot.lane.b32.xlu1 %v67_v20, %s671_s7  ;;  %s784_s20 = sld [smem:[#allocation3 + $0xe]]  ;;  %v112_v37 = vstv %s736_s30  ;;  %v214_v39 = vmul.f32 %v761_v30, %v105_v28  ;;  %v215_v40 = vmul.f32 %v766_v31, %v108_v29  ;;  %v106_v41 = vmul.f32 %v105_v28, %v777_v34 }
  0x15   :  { %v51_v27 = vadd.f32 %v50_v21, %v47_v22  ;;  %s794_s22 = sld [smem:[#allocation3 + $0x16]]  ;;  %v109_v42 = vmul.f32 %v782_v35, %v108_v29  ;;  %v179_v43 = vadd.f32 %v178_v32, %v177_v33  ;;  %v217_v44 = vmul.f32 %v790_v38, %v112_v37  ;;  %v861_v22 = vld [vmem:[%s956_s0 + $0x3c] sm:$0xff] }
  0x16   :  { %s796_s23 = sld [smem:[#allocation3 + $0x1a]]  ;;  %v216_v47 = vadd.f32 %v215_v40, %v214_v39  ;;  %v152_v49 = vstv %s746_s5  ;;  %v155_v53 = vstv %s750_s6  ;;  %v113_v57 = vmul.f32 %v804_v45, %v112_v37 }
  0x17   :  { %53 = vrot.lane.b32.xlu0 %v51_v27, %s672_s15  ;;  %s814_s28 = sld [smem:[#allocation3 + $0x17]]  ;;  %v110_v56 = vadd.f32 %v109_v42, %v106_v41  ;;  %v153_v59 = vmul.f32 %v152_v49, %v811_v48  ;;  %v156_v3 = vmul.f32 %v821_v52, %v155_v53  ;;  %v136_v5 = vstv %s754_s8 }
  0x18   :  { %v89_v46 = vstv %s768_s13  ;;  %v218_v63 = vadd.f32 %v217_v44, %v216_v47  ;;  %v233_v14 = vmul.f32 %v838_v8, %v136_v5  ;;  %v137_v23 = vmul.f32 %v136_v5, %v811_v48  ;;  %s547_s0 = sld [smem:[#allocation3 + $0x1]] }
  0x19   :  { %v90_v50 = vmul.f32 %v89_v46, %v777_v34  ;;  %v92_v51 = vstv %s770_s14  ;;  %v204_v61 = vmul.f32 %v761_v30, %v89_v46  ;;  %v114_v13 = vadd.f32 %v113_v57, %v110_v56  ;;  %s25_s12 = sld [smem:[#allocation3]] }
  0x1a   :  { %v93_v54 = vmul.f32 %v782_v35, %v92_v51  ;;  %v96_v55 = vstv %s784_s20  ;;  %v205_v62 = vmul.f32 %v766_v31, %v92_v51  ;;  %v157_v19 = vadd.f32 %v156_v3, %v153_v59  ;;  %s549_s13 = sld [smem:[#allocation3 + $0x2]] }
  0x1b   :  { %v97_v58 = vmul.f32 %v804_v45, %v96_v55  ;;  %v139_v6 = vstv %s794_s22  ;;  %v207_v16 = vmul.f32 %v790_v38, %v96_v55  ;;  %v243_v37 = vmul.f32 %v838_v8, %v152_v49  ;;  %s557_s14 = sld [smem:[#allocation3 + $0x9]] }
  0x1c   :  { %191 = vrot.lane.b32.xlu1 %v189_v36, %s671_s7  ;;  %v94_v60 = vadd.f32 %v93_v54, %v90_v50  ;;  %v159_v11 = vstv %s796_s23  ;;  %v234_v15 = vmul.f32 %v843_v9, %v139_v6  ;;  %v206_v18 = vadd.f32 %v205_v62, %v204_v61  ;;  %s558_s16 = sld [smem:[#allocation3 + $0xa]] }
  0x1d   :  { %v160_v20 = vmul.f32 %v848_v10, %v159_v11  ;;  %v143_v21 = vstv %s814_s28  ;;  %v140_v27 = vmul.f32 %v821_v52, %v139_v6  ;;  %v244_v39 = vmul.f32 %v843_v9, %v155_v53  ;;  %s560_s17 = sld [smem:[#allocation3 + $0xb]] }
  0x1e   :  { %v98_v12 = vadd.f32 %v97_v58, %v94_v60  ;;  %v235_v24 = vadd.f32 %v234_v15, %v233_v14  ;;  %v236_v25 = vmul.f32 %v861_v22, %v143_v21  ;;  %v208_v26 = vadd.f32 %v207_v16, %v206_v18  ;;  %s879_s18 = sld [smem:[#allocation3 + $0x12]] }
  0x1f   :  { %181 = vrot.lane.b32.xlu0 %v179_v43, %s672_s15  ;;  %v161_v28 = vadd.f32 %v160_v20, %v157_v19  ;;  %v141_v32 = vadd.f32 %v140_v27, %v137_v23  ;;  %v144_v33 = vmul.f32 %v848_v10, %v143_v21  ;;  %v245_v40 = vadd.f32 %v244_v39, %v243_v37  ;;  %s881_s19 = sld [smem:[#allocation3 + $0x13]] }
  0x20   :  { %100 = vrot.lane.b32.xlu2 %v98_v12, %s672_s15  ;;  %v237_v29 = vadd.f32 %v236_v25, %v235_v24  ;;  %v246_v41 = vmul.f32 %v861_v22, %v159_v11  ;;  %v32_v43 = vstv %s547_s0  ;;  %v27_v44 = vstv %s25_s12  ;;  %s887_s20 = sld [smem:[#allocation3 + $0x14]] }
  0x21   :  { %v145_v36 = vadd.f32 %v144_v33, %v141_v32  ;;  %v33_v46 = vmul.f32 %v706_v1, %v32_v43  ;;  %v28_v47 = vmul.f32 %v27_v44, %v701_v0  ;;  %v38_v49 = vstv %s549_s13  ;;  %s585_s29 = sld [smem:[#allocation3 + $0x24]] }
  0x22   :  { %v247_v42 = vadd.f32 %v246_v41, %v245_v40  ;;  %v39_v51 = vmul.f32 %v713_v2, %v38_v49  ;;  %v75_v54 = vstv %s557_s14  ;;  %v79_v55 = vstv %s558_s16  ;;  %s586_s30 = sld [smem:[#allocation3 + $0x25]] }
  0x23   :  { %v34_v53 = vadd.f32 %v33_v46, %v28_v47  ;;  %v170_v57 = vmul.f32 %v726_v7, %v32_v43  ;;  %v168_v1 = vmul.f32 %v718_v4, %v27_v44  ;;  %v76_v58 = vmul.f32 %v75_v54, %v777_v34  ;;  %s588_s10 = sld [smem:[#allocation3 + $0x1c]] }
  0x24   :  { %220 = vrot.lane.b32.xlu1 %v218_v63, %s671_s7  ;;  %v80_v59 = vmul.f32 %v782_v35, %v79_v55  ;;  %v84_v60 = vstv %s560_s17  ;;  %v173_v61 = vmul.f32 %v741_v17, %v38_v49  ;;  %v196_v63 = vmul.f32 %v761_v30, %v75_v54  ;;  %s589_s8 = sld [smem:[#allocation3 + $0x1d]] }
  0x25   :  { %v40_v0 = vadd.f32 %v39_v51, %v34_v53  ;;  %v171_v62 = vadd.f32 %v170_v57, %v168_v1  ;;  %v198_v7 = vmul.f32 %v766_v31, %v79_v55  ;;  %v85_v5 = vmul.f32 %v804_v45, %v84_v60  ;;  %s591_s11 = sld [smem:[#allocation3 + $0x1f]] }
  0x26   :  { %v81_v4 = vadd.f32 %v80_v59, %v76_v58  ;;  %v122_v34 = vstv %s879_s18  ;;  %v126_v11 = vstv %s881_s19  ;;  %v201_v14 = vmul.f32 %v790_v38, %v84_v60  ;;  %s592_s0 = sld [smem:[#allocation3 + $0x20]] }
  0x27   :  { %116 = vrot.lane.b32.xlu0 %v114_v13, %s671_s7  ;;  %v174_v12 = vadd.f32 %v173_v61, %v171_v62  ;;  %v199_v13 = vadd.f32 %v198_v7, %v196_v63  ;;  %v123_v16 = vmul.f32 %v122_v34, %v811_v48  ;;  %v127_v30 = vmul.f32 %v821_v52, %v126_v11  ;;  %s594_s12 = sld [smem:[#allocation3 + $0x22]] }
  0x28   :  { %210 = vrot.lane.b32.xlu2 %v208_v26, %s672_s15  ;;  %v86_v17 = vadd.f32 %v85_v5, %v81_v4  ;;  %v131_v18 = vstv %s887_s20  ;;  %v225_v45 = vmul.f32 %v838_v8, %v122_v34  ;;  %v227_v21 = vmul.f32 %v843_v9, %v126_v11  ;;  %s595_s13 = sld [smem:[#allocation3 + $0x23]] }
  0x29   :  { %v202_v20 = vadd.f32 %v201_v14, %v199_v13  ;;  %v128_v25 = vadd.f32 %v127_v30, %v123_v16  ;;  %v132_v26 = vmul.f32 %v848_v10, %v131_v18  ;;  %v230_v33 = vmul.f32 %v861_v22, %v131_v18  ;;  %s587_s14 = sld [smem:[#allocation3 + $0x1b]] }
  0x2a   :  { %s590_s16 = sld [smem:[#allocation3 + $0x1e]] }
  0x2b   :  { %v133_v52 = vadd.f32 %v132_v26, %v128_v25  ;;  %s593_s17 = sld [smem:[#allocation3 + $0x21]] }
  0x2c   :  { %163 = vrot.lane.b32.xlu1 %v161_v28, %s671_s7 }
  0x2f   :  { %239 = vrot.lane.b32.xlu0 %v237_v29, %s672_s15  ;;  %v228_v29 = vadd.f32 %v227_v21, %v225_v45 }
  0x30   :  { %147 = vrot.lane.b32.xlu2 %v145_v36, %s672_s15 }
  0x31   :  { %v231_v40 = vadd.f32 %v230_v33, %v228_v29 }
  0x38   :  { %249 = vrot.lane.b32.xlu2 %v247_v42, %s671_s7 }
  0x7a   :  { %v101_v50 = vpop.permute.xlu2 %100 }
  0x82   :  { %v211_v6 = vpop.permute.xlu2 %210 }
  0x86   :  { %v70_v56 = vpop.permute.xlu1 %69 }
  0x89   :  { %v54_v2 = vpop.permute.xlu0 %53 }
  0x8a   :  { %v56_v3 = vadd.f32 %v54_v2, %v40_v0  ;;  %v148_v28 = vpop.permute.xlu2 %147 }
  0x8c   :  { %v72_v15 = vadd.f32 %v70_v56, %v56_v3 }
  0x8e   :  { %v192_v35 = vpop.permute.xlu1 %191  ;;  %v87_v23 = vadd.f32 %v86_v17, %v72_v15 }
  0x90   :  { %v103_v48 = vadd.f32 %v101_v50, %v87_v23 }
  0x91   :  { %v182_v31 = vpop.permute.xlu0 %181 }
  0x92   :  { %v184_v19 = vadd.f32 %v182_v31, %v174_v12  ;;  %v250_v44 = vpop.permute.xlu2 %249 }
  0x94   :  { %v194_v24 = vadd.f32 %v192_v35, %v184_v19 }
  0x96   :  { %v203_v38 = vadd.f32 %v202_v20, %v194_v24  ;;  %v221_v27 = vpop.permute.xlu1 %220 }
  0x98   :  { %v213_v32 = vadd.f32 %v211_v6, %v203_v38 }
  0x99   :  { %v117_v36 = vpop.permute.xlu0 %116 }
  0x9a   :  { %v119_v37 = vadd.f32 %v117_v36, %v103_v48  ;;  %v223_v39 = vadd.f32 %v221_v27, %v213_v32 }
  0x9c   :  { %v134_v8 = vadd.f32 %v133_v52, %v119_v37  ;;  %v232_v10 = vadd.f32 %v231_v40, %v223_v39 }
  0x9e   :  { %v150_v9 = vadd.f32 %v148_v28, %v134_v8  ;;  %v164_v41 = vpop.permute.xlu1 %163  ;;  %v673_v28 = vmov 0.0  }
  0x9f   :  { %323 = vst.msk [vmem:[#allocation2 + $0x8] sm:$0xff] %vm321_vm4, %v673_v28 }
  0xa0   :  { %v903_v42 = vadd.f32 %v164_v41, %v150_v9  ;;  %325 = vst.msk [vmem:[#allocation2 + $0x10] sm:$0xf] %vm324_vm5, %v673_v28  ;;  %v350_v9 = vstv %s588_s10  ;;  %v358_v41 = vstv %s589_s8  ;;  %s677_s10 = smov 8  }
  0xa1   :  { %v240_v43 = vpop.permute.xlu0 %239  ;;  %322 = vst.msk [vmem:[#allocation2] sm:$0xff] %vm321_vm4, %v673_v28 }
  0xa2   :  { %v242_v46 = vadd.f32 %v240_v43, %v232_v10  ;;  %v256_v47 = vsel %vm255_vm0, %v903_v42, 0.0 }
  0xa3   :  { %257 = vadd.xlane.f32.xlu0 %v256_v47  ;;  %v371_v47 = vstv %s591_s11 }
  0xa4   :  { %v907_v49 = vadd.f32 %v250_v44, %v242_v46 }
  0xa6   :  { %v266_v22 = vsel %vm255_vm0, %v907_v49, 0.0 }
  0xa7   :  { %267 = vadd.xlane.f32.xlu1 %v266_v22 }
 0x116   :  { %v258_v50 = vpop.xlane.xlu0 %257 }
 0x117   :  { %v259_v51 = vrot.slane %v258_v50, 4 }
 0x119   :  { %v260_v53 = vadd.f32 %v259_v51, %v258_v50 }
 0x11a   :  { %v268_v54 = vpop.xlane.xlu1 %267 }
 0x11b   :  { %v261_v55 = vrot.slane %v260_v53, 2  ;;  %v269_v56 = vrot.slane %v268_v54, 4 }
 0x11d   :  { %v270_v57 = vadd.f32 %v269_v56, %v268_v54  ;;  %v262_v1 = vadd.f32 %v261_v55, %v260_v53  ;;  %v379_v54 = vstv %s592_s0  ;;  %v392_v56 = vstv %s594_s12 }
 0x11f   :  { %v271_v0 = vrot.slane %v270_v57, 2  ;;  %v263_v58 = vrot.slane %v262_v1, 1 }
 0x121   :  { %v264_v59 = vadd.f32 %v263_v58, %v262_v1  ;;  %v272_v2 = vadd.f32 %v271_v0, %v270_v57 }
 0x123   :  { %598 = vpush %v264_v59  ;;  %v273_v60 = vrot.slane %v272_v2, 1  ;;  %v400_v59 = vstv %s595_s13 }
 0x125   :  { %v274_v61 = vadd.f32 %v273_v60, %v272_v2 }
 0x127   :  { %600 = vpush %v274_v61 }
 0x154   :  { %s599_s1 = spop %598 }
 0x158   :  { %s601_s21 = spop %600 }
 0x159   :  { %s276_s22 = sadd.f32 %s601_s21, %s599_s1 }
 0x15b   :  { %s911_s23 = smul.f32 0.0078125, %s276_s22 }
 0x15d   :  { %v278_v62 = vstv %s911_s23 }
 0x15e   :  { %v279_v63 = vsub.f32 %v903_v42, %v278_v62  ;;  %v291_v4 = vsub.f32 %v907_v49, %v278_v62 }
 0x160   :  { %v280_v7 = vmul.f32 %v279_v63, %v279_v63  ;;  %v292_v5 = vmul.f32 %v291_v4, %v291_v4  ;;  %v347_v63 = vstv %s587_s14 }
 0x162   :  { %v281_v3 = vsel %vm255_vm0, %v280_v7, 0.0  ;;  %v293_v6 = vsel %vm255_vm0, %v292_v5, 0.0 }
 0x163   :  { %282 = vadd.xlane.f32.xlu2 %v281_v3  ;;  %v367_v3 = vstv %s590_s16 }
 0x16b   :  { %294 = vadd.xlane.f32.xlu2 %v293_v6 }
 0x1d6   :  { %v283_v34 = vpop.xlane.xlu2 %282 }
 0x1d7   :  { %v284_v11 = vrot.slane %v283_v34, 4 }
 0x1d9   :  { %v285_v35 = vadd.f32 %v284_v11, %v283_v34 }
 0x1db   :  { %v286_v12 = vrot.slane %v285_v35, 2 }
 0x1dd   :  { %v287_v13 = vadd.f32 %v286_v12, %v285_v35 }
 0x1de   :  { %v295_v14 = vpop.xlane.xlu2 %294 }
 0x1df   :  { %v296_v15 = vrot.slane %v295_v14, 4  ;;  %v288_v17 = vrot.slane %v287_v13, 1 }
 0x1e1   :  { %v297_v16 = vadd.f32 %v296_v15, %v295_v14  ;;  %v289_v30 = vadd.f32 %v288_v17, %v287_v13 }
 0x1e3   :  { %v298_v31 = vrot.slane %v297_v16, 2  ;;  %602 = vpush %v289_v30 }
 0x1e5   :  { %v299_v18 = vadd.f32 %v298_v31, %v297_v16 }
 0x1e7   :  { %v300_v19 = vrot.slane %v299_v18, 1 }
 0x1e9   :  { %v301_v20 = vadd.f32 %v300_v19, %v299_v18  ;;  %v388_v19 = vstv %s593_s17 }
 0x1eb   :  { %604 = vpush %v301_v20 }
 0x214   :  { %s603_s24 = spop %602 }
 0x21c   :  { %s605_s25 = spop %604 }
 0x21d   :  { %s303_s26 = sadd.f32 %s605_s25, %s603_s24 }
 0x21e   :  { %s596_s24 = sld [smem:[#allocation3 + $0x26]] }
 0x21f   :  { %s304_s27 = smul.f32 0.0078125, %s303_s26  ;;  %s597_s25 = sld [smem:[#allocation3 + $0x27]] }
 0x221   :  { %s305_s28 = sadd.f32 1e-05, %s304_s27 }
 0x223   :  { %v306_v45 = vstv %s305_s28 }
 0x224   :  { %626 = vrsqrt.f32 %v306_v45  ;;  %vm313_vm2 = vweird.f32 %v306_v45 }
 0x22a   :  { %v627_v21 = vpop.eup %626 }
 0x22b   :  { %v308_v23 = vmul.f32 %v627_v21, %v306_v45  ;;  %vm314_vm1 = vweird.f32 %v627_v21 }
 0x22c   :  { %vm315_vm3 = vmor %vm313_vm2, %vm314_vm1 }
 0x22d   :  { %v309_v24 = vmul.f32 %v627_v21, %v308_v23 }
 0x22f   :  { %v310_v25 = vmul.f32 0.5, %v309_v24 }
 0x231   :  { %v311_v26 = vsub.f32 1.5, %v310_v25 }
 0x233   :  { %v312_v38 = vmul.f32 %v627_v21, %v311_v26 }
 0x235   :  { %v316_v27 = vsel %vm315_vm3, %v627_v21, %v312_v38 }
 0x236   :  { %606 = vpush %v316_v27 }
 0x267   :  { %s607_s3 = spop %606 }
 0x268   :  { %s318_s4 = smul.f32 %s607_s3, %s585_s29 }
 0x26a   :  { %s319_s5 = smul.f32 %s318_s4, %s911_s23  ;;  %v326_v29 = vstv %s318_s4 }
 0x26b   :  { %v327_v48 = vmul.f32 %v326_v29, %v903_v42  ;;  %v337_v32 = vmul.f32 %v326_v29, %v907_v49 }
 0x26c   :  { %s320_s6 = ssub.f32 %s586_s30, %s319_s5  ;;  %s675_s30 = smov [#allocation6]  }
 0x26d   :  { %s532_s3 = sshll.u32 %s675_s30, 4  ;;  %s533_s3 = int_to_ptr.vmem [resolvable:$true] %s532_s3 }
 0x26e   :  { %v328_v52 = vstv %s320_s6  ;;  %s534_s6 = sshll.u32 %s958_s2, 4  ;;  %s535_s6 = int_to_ptr.hbm [resolvable:$true] %s534_s6 }
 0x26f   :  { %v338_v33 = vadd.f32 %v337_v32, %v328_v52  ;;  %v329_v36 = vadd.f32 %v328_v52, %v327_v48 }
 0x271   :  { %v339_v37 = vmax.f32 %v338_v33, 0.0  ;;  %v330_v39 = vmax.f32 %v329_v36, 0.0 }
 0x273   :  { %341 = vrot.lane.b32.xlu1 %v339_v37, %s674_s9  ;;  %332 = vrot.lane.b32.xlu0 %v330_v39, %s674_s9  ;;  %s676_s9 = smov 128  }
 0x2e5   :  { %v342_v8 = vpop.permute.xlu1 %341  ;;  %v333_v40 = vpop.permute.xlu0 %332 }
 0x2e6   :  { %344 = vst.msk [vmem:[#allocation2 + $0xb] sm:$0xff] %vm335_vm6, %v342_v8 }
 0x2e7   :  { %336 = vst.msk [vmem:[#allocation2 + $0x1] sm:$0xff] %vm335_vm6, %v333_v40 }
 0x2ed   :  { %v407_v42 = vld [vmem:[#allocation2 + $0xa] sm:$0xff] }
 0x2ee   :  { %v409_v10 = vmul.f32 %v407_v42, %v350_v9  ;;  %v346_v43 = vld [vmem:[#allocation2] sm:$0xff]  ;;  %v421_v49 = vld [vmem:[#allocation2 + $0xb] sm:$0xff]  ;;  %v415_v50 = vmul.f32 %v407_v42, %v358_v41  ;;  %v408_v13 = vmul.f32 %v407_v42, %v347_v63 }
 0x2ef   :  { %v359_v44 = vmul.f32 %v358_v41, %v346_v43  ;;  %v351_v46 = vmul.f32 %v350_v9, %v346_v43  ;;  %v366_v22 = vld [vmem:[#allocation2 + $0x1] sm:$0xff]  ;;  %v424_v51 = vmul.f32 %v421_v49, %v371_v47  ;;  %v430_v0 = vmul.f32 %v421_v49, %v379_v54  ;;  %v436_v58 = vld [vmem:[#allocation2 + $0xc] sm:$0xff] }
 0x2f0   :  { %411 = vrot.lane.b32.xlu0 %v409_v10, %s672_s15  ;;  %v372_v53 = vmul.f32 %v371_v47, %v366_v22  ;;  %v387_v55 = vld [vmem:[#allocation2 + $0x2] sm:$0xff]  ;;  %v380_v57 = vmul.f32 %v379_v54, %v366_v22  ;;  %v439_v2 = vmul.f32 %v436_v58, %v392_v56  ;;  %v445_v60 = vmul.f32 %v436_v58, %v400_v59 }
 0x2f1   :  { %361 = vrot.lane.b32.xlu1 %v359_v44, %s671_s7  ;;  %353 = vrot.lane.b32.xlu2 %v351_v46, %s672_s15  ;;  %v393_v1 = vmul.f32 %v392_v56, %v387_v55  ;;  %v401_v61 = vmul.f32 %v400_v59, %v387_v55  ;;  %v348_v7 = vmul.f32 %v347_v63, %v346_v43 }
 0x2f2   :  { %v368_v11 = vmul.f32 %v367_v3, %v366_v22  ;;  %v422_v16 = vmul.f32 %v421_v49, %v367_v3  ;;  %v437_v23 = vmul.f32 %v436_v58, %v388_v19  ;;  %v389_v26 = vmul.f32 %v388_v19, %v387_v55 }
 0x2f8   :  { %417 = vrot.lane.b32.xlu0 %v415_v50, %s671_s7 }
 0x2f9   :  { %426 = vrot.lane.b32.xlu1 %v424_v51, %s672_s15  ;;  %374 = vrot.lane.b32.xlu2 %v372_v53, %s672_s15 }
 0x300   :  { %382 = vrot.lane.b32.xlu0 %v380_v57, %s671_s7 }
 0x301   :  { %395 = vrot.lane.b32.xlu1 %v393_v1, %s672_s15  ;;  %432 = vrot.lane.b32.xlu2 %v430_v0, %s671_s7 }
 0x308   :  { %441 = vrot.lane.b32.xlu0 %v439_v2, %s672_s15 }
 0x309   :  { %447 = vrot.lane.b32.xlu1 %v445_v60, %s671_s7  ;;  %403 = vrot.lane.b32.xlu2 %v401_v61, %s671_s7 }
 0x34b   :  { %v354_v62 = vpop.permute.xlu2 %353 }
 0x34c   :  { %v356_v4 = vadd.f32 %v354_v62, %v348_v7 }
 0x353   :  { %v375_v34 = vpop.permute.xlu2 %374 }
 0x35b   :  { %v433_v18 = vpop.permute.xlu2 %432 }
 0x362   :  { %v412_v5 = vpop.permute.xlu0 %411 }
 0x363   :  { %v362_v6 = vpop.permute.xlu1 %361  ;;  %v414_v14 = vadd.f32 %v412_v5, %v408_v13  ;;  %v404_v48 = vpop.permute.xlu2 %403 }
 0x364   :  { %v364_v35 = vadd.f32 %v362_v6, %v356_v4 }
 0x366   :  { %v369_v12 = vadd.f32 %v368_v11, %v364_v35 }
 0x368   :  { %v377_v45 = vadd.f32 %v375_v34, %v369_v12 }
 0x36a   :  { %v418_v15 = vpop.permute.xlu0 %417 }
 0x36b   :  { %v427_v17 = vpop.permute.xlu1 %426  ;;  %v420_v30 = vadd.f32 %v418_v15, %v414_v14 }
 0x36d   :  { %v423_v31 = vadd.f32 %v422_v16, %v420_v30 }
 0x36f   :  { %v429_v20 = vadd.f32 %v427_v17, %v423_v31 }
 0x371   :  { %v435_v21 = vadd.f32 %v433_v18, %v429_v20 }
 0x372   :  { %v383_v24 = vpop.permute.xlu0 %382 }
 0x373   :  { %v396_v25 = vpop.permute.xlu1 %395  ;;  %v385_v38 = vadd.f32 %v383_v24, %v377_v45  ;;  %v438_v27 = vadd.f32 %v437_v23, %v435_v21 }
 0x375   :  { %v390_v28 = vadd.f32 %v389_v26, %v385_v38 }
 0x377   :  { %v398_v29 = vadd.f32 %v396_v25, %v390_v28 }
 0x379   :  { %v933_v32 = vadd.f32 %v404_v48, %v398_v29 }
 0x37a   :  { %v442_v52 = vpop.permute.xlu0 %441 }
 0x37b   :  { %v444_v33 = vadd.f32 %v442_v52, %v438_v27  ;;  %v453_v36 = vsel %vm255_vm0, %v933_v32, 0.0  ;;  %v448_v37 = vpop.permute.xlu1 %447 }
 0x37c   :  { %454 = vadd.xlane.f32.xlu0 %v453_v36 }
 0x37d   :  { %v937_v39 = vadd.f32 %v448_v37, %v444_v33 }
 0x37f   :  { %v463_v8 = vsel %vm255_vm0, %v937_v39, 0.0 }
 0x380   :  { %464 = vadd.xlane.f32.xlu2 %v463_v8 }
 0x3ef   :  { %v455_v40 = vpop.xlane.xlu0 %454 }
 0x3f0   :  { %v456_v9 = vrot.slane %v455_v40, 4 }
 0x3f2   :  { %v457_v41 = vadd.f32 %v456_v9, %v455_v40 }
 0x3f3   :  { %v465_v42 = vpop.xlane.xlu2 %464 }
 0x3f4   :  { %v458_v10 = vrot.slane %v457_v41, 2  ;;  %v466_v43 = vrot.slane %v465_v42, 4 }
 0x3f6   :  { %v467_v44 = vadd.f32 %v466_v43, %v465_v42  ;;  %v459_v46 = vadd.f32 %v458_v10, %v457_v41 }
 0x3f8   :  { %v468_v47 = vrot.slane %v467_v44, 2  ;;  %v460_v49 = vrot.slane %v459_v46, 1 }
 0x3fa   :  { %v469_v22 = vadd.f32 %v468_v47, %v467_v44  ;;  %v461_v50 = vadd.f32 %v460_v49, %v459_v46 }
 0x3fc   :  { %608 = vpush %v461_v50  ;;  %v470_v51 = vrot.slane %v469_v22, 1 }
 0x3fe   :  { %v471_v53 = vadd.f32 %v470_v51, %v469_v22 }
 0x400   :  { %610 = vpush %v471_v53 }
 0x42d   :  { %s609_s7 = spop %608 }
 0x431   :  { %s611_s15 = spop %610 }
 0x432   :  { %s473_s18 = sadd.f32 %s611_s15, %s609_s7 }
 0x434   :  { %s941_s19 = smul.f32 0.0078125, %s473_s18 }
 0x436   :  { %v475_v54 = vstv %s941_s19 }
 0x437   :  { %v488_v55 = vsub.f32 %v937_v39, %v475_v54  ;;  %v476_v56 = vsub.f32 %v933_v32, %v475_v54 }
 0x439   :  { %v489_v57 = vmul.f32 %v488_v55, %v488_v55  ;;  %v477_v1 = vmul.f32 %v476_v56, %v476_v56 }
 0x43b   :  { %v490_v0 = vsel %vm255_vm0, %v489_v57, 0.0  ;;  %v478_v58 = vsel %vm255_vm0, %v477_v1, 0.0 }
 0x43c   :  { %491 = vadd.xlane.f32.xlu0 %v490_v0  ;;  %479 = vadd.xlane.f32.xlu1 %v478_v58 }
 0x4af   :  { %v492_v59 = vpop.xlane.xlu0 %491  ;;  %v480_v2 = vpop.xlane.xlu1 %479 }
 0x4b0   :  { %v493_v60 = vrot.slane %v492_v59, 4  ;;  %v481_v61 = vrot.slane %v480_v2, 4 }
 0x4b2   :  { %v494_v62 = vadd.f32 %v493_v60, %v492_v59  ;;  %v482_v63 = vadd.f32 %v481_v61, %v480_v2 }
 0x4b4   :  { %v495_v7 = vrot.slane %v494_v62, 2  ;;  %v483_v3 = vrot.slane %v482_v63, 2 }
 0x4b6   :  { %v496_v4 = vadd.f32 %v495_v7, %v494_v62  ;;  %v484_v5 = vadd.f32 %v483_v3, %v482_v63 }
 0x4b8   :  { %v485_v6 = vrot.slane %v484_v5, 1  ;;  %v497_v34 = vrot.slane %v496_v4, 1 }
 0x4ba   :  { %v486_v11 = vadd.f32 %v485_v6, %v484_v5  ;;  %v498_v35 = vadd.f32 %v497_v34, %v496_v4 }
 0x4bc   :  { %612 = vpush %v486_v11 }
 0x4bd   :  { %614 = vpush %v498_v35 }
 0x4ed   :  { %s613_s20 = spop %612 }
 0x4ee   :  { %s615_s1 = spop %614 }
 0x4ef   :  { %s500_s21 = sadd.f32 %s615_s1, %s613_s20 }
 0x4f1   :  { %s501_s22 = smul.f32 0.0078125, %s500_s21 }
 0x4f3   :  { %s502_s23 = sadd.f32 1e-05, %s501_s22 }
 0x4f5   :  { %v503_v12 = vstv %s502_s23 }
 0x4f6   :  { %628 = vrsqrt.f32 %v503_v12  ;;  %vm510_vm8 = vweird.f32 %v503_v12 }
 0x4fc   :  { %v629_v13 = vpop.eup %628 }
 0x4fd   :  { %v505_v14 = vmul.f32 %v629_v13, %v503_v12  ;;  %vm511_vm7 = vweird.f32 %v629_v13 }
 0x4fe   :  { %vm512_vm9 = vmor %vm510_vm8, %vm511_vm7 }
 0x4ff   :  { %v506_v15 = vmul.f32 %v629_v13, %v505_v14 }
 0x501   :  { %v507_v17 = vmul.f32 0.5, %v506_v15 }
 0x503   :  { %v508_v16 = vsub.f32 1.5, %v507_v17 }
 0x505   :  { %v509_v30 = vmul.f32 %v629_v13, %v508_v16 }
 0x507   :  { %v513_v31 = vsel %vm512_vm9, %v629_v13, %v509_v30 }
 0x508   :  { %616 = vpush %v513_v31 }
 0x539   :  { %s617_s26 = spop %616 }
 0x53a   :  { %s515_s27 = smul.f32 %s617_s26, %s596_s24 }
 0x53c   :  { %s516_s28 = smul.f32 %s515_s27, %s941_s19  ;;  %v518_v18 = vstv %s515_s27 }
 0x53d   :  { %v519_v19 = vmul.f32 %v518_v18, %v933_v32  ;;  %v524_v20 = vmul.f32 %v518_v18, %v937_v39 }
 0x53e   :  { %s517_s29 = ssub.f32 %s597_s25, %s516_s28 }
 0x540   :  { %v520_v45 = vstv %s517_s29 }
 0x541   :  { %v521_v21 = vadd.f32 %v520_v45, %v519_v19  ;;  %v525_v23 = vadd.f32 %v524_v20, %v520_v45 }
 0x543   :  { %v522_v24 = vmax.f32 %v521_v21, 0.0  ;;  %v526_v25 = vmax.f32 %v525_v23, 0.0 }
 0x545   :  { %523 = vst.msk [vmem:[#allocation6] sm:$0xff] %vm255_vm0, %v522_v24 }
 0x546   :  { %527 = vst.msk [vmem:[#allocation6 + $0x8] sm:$0xff] %vm255_vm0, %v526_v25 }
 0x547   :  { %540 = dma.vmem_to_hbm [thread:$0]  %s533_s3, 256, %s535_s6, [#allocation4], %s676_s9, %s676_s9, %s677_s10  }
 0x548   :  { %668 = dma.done.wait [#allocation4], 256  }
 0x549   :  { %669 = vsyncadd [#allocation4], 4294967040 }
 0x54a   :  { %545 = vsyncpa [#allocation4], 1 }
 0x54b   :  { %546 = vsyncpa [#allocation5], 1 }

</bundles_post_ra>
